<compile_context>
chip_gen: v6e
topology: v6e:2x2x1
jax: 0.10.0
libtpu: 0.0.40
codegen_flags: <defaults>
</compile_context>

<pallas_src>
from functools import partial

import jax
import jax.numpy as jnp
from jax.experimental import pallas as pl
from jax.experimental.pallas import tpu as pltpu

_HIGHEST = jax.lax.Precision.HIGHEST


def _dsa_kernel(x_ref, mask_ref, w_ref, b_ref, sel_ref, selt_ref, out_ref, *,
                r, neg_slope):
    """One grid step = a tile of `bt` batch elements, all heads folded into lanes."""
    bt, seq, din = x_ref.shape          # (Bt, T, Din)
    hdp = w_ref.shape[1]                # H*Ddim padded to a multiple of 128
    nh = sel_ref.shape[0]               # number of heads

    x2 = x_ref[...].reshape(bt * seq, din)   # fold batch tile into the matmul M dim
    mask3 = mask_ref[...]                    # (Bt, T, 1) float 0/1 mask
    w = w_ref[...]                           # (Din, HDp)  packed per-head weights
    bias = b_ref[...]                        # (1, HDp)
    sel = sel_ref[...]                       # (H, HDp)   0/1: head -> its lanes
    sel_t = selt_ref[...]                    # (HDp, H)   0/1: lanes -> their head

    # ---- Linear for all heads & all batch rows: ONE MXU matmul (fp32-faithful) ----
    y = jnp.dot(x2, w, preferred_element_type=jnp.float32,
                precision=_HIGHEST) + bias                       # (Bt*T, HDp)
    p2 = jnp.where(y >= 0.0, y, jnp.float32(neg_slope) * y)      # leaky_relu
    p3 = p2.reshape(bt, seq, hdp)                                # (Bt, T, HDp)

    # ---- mask broadcasts hoisted out of the routing loop ----
    mask_h = jnp.broadcast_to(mask3, (bt, seq, nh))              # (Bt, T, H)
    softmax_mask_h = jnp.where(mask_h == 0.0, jnp.float32(-1e20), mask_h)

    q = jnp.zeros((bt, seq, nh), jnp.float32)      # routing logits, heads in lanes
    z = jnp.zeros((bt, 1, hdp), jnp.float32)

    # r is tiny and serially dependent -> unrolled Python loop.
    for _ in range(r):
        # Carried update matches the PyTorch in-place `q *= softmax_mask`.
        q = q * softmax_mask_h                                   # (Bt, T, H)
        qmax = jnp.max(q, axis=1, keepdims=True)                 # softmax over T
        e = jnp.exp(q - qmax)
        inv = 1.0 / jnp.sum(e, axis=1, keepdims=True)            # (Bt, 1, H) divide
        a = e * inv * mask_h                                     # zero padded tokens
        # Per-head broadcast over lanes: (Bt*T, H) @ (H, HDp).  `sel` is exact 0/1,
        # so default (one-pass bf16 operand, fp32 accumulate) precision only rounds
        # `a` (~1e-3 relative) while avoiding the 6-pass fp32 MXU decomposition.
        a_rep = jnp.dot(a.reshape(bt * seq, nh), sel,
                        preferred_element_type=jnp.float32).reshape(bt, seq, hdp)
        s = jnp.sum(a_rep * p3, axis=1, keepdims=True)           # (Bt, 1, HDp)
        z = jnp.tanh(s)
        # Per-head lane reduction: (Bt*T, HDp) @ (HDp, H).
        dq = jnp.dot((p3 * z).reshape(bt * seq, hdp), sel_t,
                     preferred_element_type=jnp.float32).reshape(bt, seq, nh)
        q = q + dq

    out_ref[...] = z.reshape(bt, hdp)            # lane/sublane-dense (Bt, HDp) store


def dsa_forward(x, mask, w, b, *, dsa_r=3, neg_slope=0.01, block_b=32):
    """x: (B, T, Din); mask: (B, T); w: (H, Din, Ddim); b: (H, Ddim).
    Returns (B, H*Ddim), matching torch.cat(z_list, dim=-1).
    `block_b` is the batch tile per grid step (tune down for v7x's 64 MiB VMEM,
    up for v6e's 128 MiB).  T should ideally be a multiple of 8 for free reshapes."""
    B, T, Din = x.shape
    H, _, Ddim = w.shape
    HD = H * Ddim
    HDp = ((HD + 127) // 128) * 128          # pad packed lanes to a multiple of 128

    # Batch tile: multiple of 8 so the 2-D output block is sublane-dense.
    bt = min(block_b, B)
    bt = ((bt + 7) // 8) * 8
    Bp = ((B + bt - 1) // bt) * bt           # pad batch to a multiple of the tile

    xf = x.astype(jnp.float32)
    maskf = mask.astype(jnp.float32)
    if Bp != B:
        # Dummy batch rows: x = 0, mask = 1 -> finite outputs, sliced off below.
        xf = jnp.concatenate([xf, jnp.zeros((Bp - B, T, Din), jnp.float32)], axis=0)
        maskf = jnp.concatenate([maskf, jnp.ones((Bp - B, T), jnp.float32)], axis=0)
    mask3 = maskf.reshape(Bp, T, 1)

    # Fold heads into the lane dimension: w_packed[:, h*Ddim + d] = w[h, :, d].
    w_packed = jnp.transpose(w.astype(jnp.float32), (1, 0, 2)).reshape(Din, HD)
    b_packed = b.astype(jnp.float32).reshape(1, HD)
    if HDp != HD:
        w_packed = jnp.pad(w_packed, ((0, 0), (0, HDp - HD)))
        b_packed = jnp.pad(b_packed, ((0, 0), (0, HDp - HD)))

    # Constant 0/1 head-selection matrices (hoisted out of the kernel body).
    lane_head = jnp.arange(HDp, dtype=jnp.int32) // Ddim        # pad lanes map to >= H
    sel = (jnp.arange(H, dtype=jnp.int32)[:, None] == lane_head[None, :]
           ).astype(jnp.float32)                                # (H, HDp)
    sel_t = jnp.transpose(sel)                                  # (HDp, H)

    out = pl.pallas_call(
        partial(_dsa_kernel, r=dsa_r, neg_slope=neg_slope),
        out_shape=jax.ShapeDtypeStruct((Bp, HDp), jnp.float32),
        grid_spec=pltpu.PrefetchScalarGridSpec(
            num_scalar_prefetch=0,
            grid=(Bp // bt,),                                    # parallel over batch tiles
            in_specs=[
                pl.BlockSpec((bt, T, Din), lambda i: (i, 0, 0)),   # x tile
                pl.BlockSpec((bt, T, 1), lambda i: (i, 0, 0)),     # mask tile
                pl.BlockSpec((Din, HDp), lambda i: (0, 0)),        # packed W (constant)
                pl.BlockSpec((1, HDp), lambda i: (0, 0)),          # packed bias (constant)
                pl.BlockSpec((H, HDp), lambda i: (0, 0)),          # head -> lanes 0/1
                pl.BlockSpec((HDp, H), lambda i: (0, 0)),          # lanes -> head 0/1
            ],
            out_specs=pl.BlockSpec((bt, HDp), lambda i: (i, 0)),   # lane-dense output
        ),
        compiler_params=pltpu.CompilerParams(
            dimension_semantics=("parallel",)),
    )(xf, mask3, w_packed, b_packed, sel, sel_t)
    return out[:B, :HD]


def dsa_reference(x, mask, w, b, *, dsa_r=3, neg_slope=0.01):
    """Pure-JAX per-head reference that mirrors the PyTorch forward exactly (fp32)."""
    B, T, Din = x.shape
    H, _, Ddim = w.shape
    maskf = mask.astype(jnp.float32)
    softmax_mask = jnp.where(maskf == 0.0, jnp.float32(-1e20), maskf)
    zs = []
    for h in range(H):
        y = jnp.dot(x, w[h], precision=_HIGHEST) + b[h]
        p_out = jnp.where(y >= 0.0, y, neg_slope * y)
        q = jnp.zeros((B, T), jnp.float32)
        z = jnp.zeros((B, Ddim), jnp.float32)
        for _ in range(dsa_r):
            q = q * softmax_mask
            qmax = jnp.max(q, axis=-1, keepdims=True)
            e = jnp.exp(q - qmax)
            a = e / jnp.sum(e, axis=-1, keepdims=True)
            a = a * maskf
            s = jnp.sum(a[:, :, None] * p_out, axis=1)
            z = jnp.tanh(s)
            q = q + jnp.einsum("btd,bd->bt", p_out, z, precision=_HIGHEST)
        zs.append(z)
    return jnp.concatenate(zs, axis=-1)


if __name__ == "__main__":
    # Small shapes consistent with the module.
    B, T = 2, 8                # batch, sequence length
    Din, Ddim = 32, 16         # dsa_input_dim, dsa_dim
    H = 4                      # dsa_num_attentions

    key = jax.random.PRNGKey(0)
    kx, kw, kb, kx2 = jax.random.split(key, 4)
    x = jax.random.normal(kx, (B, T, Din), dtype=jnp.float32)
    bound = 1.0 / (Din ** 0.5)   # PyTorch-style uniform init bound
    w = jax.random.uniform(kw, (H, Din, Ddim), jnp.float32, -bound, bound)
    b = jax.random.uniform(kb, (H, Ddim), jnp.float32, -bound, bound)

    # The per-head selection dots run at default (one-pass bf16-operand) MXU
    # precision per the perf review; expected error vs the fp32 reference ~1e-3.
    TOL = 5e-3

    # Check 1: full-depth routing (module default r=3) with an all-valid mask.
    mask_full = jnp.ones((B, T), jnp.float32)
    out1 = jax.block_until_ready(dsa_forward(x, mask_full, w, b, dsa_r=3))
    ref1 = dsa_reference(x, mask_full, w, b, dsa_r=3)
    assert out1.shape == (B, H * Ddim), out1.shape
    assert jnp.allclose(out1, ref1, atol=TOL, rtol=TOL), \
        float(jnp.max(jnp.abs(out1 - ref1)))

    # Check 2: padded mask.  NOTE: the original module's masked recursion overflows
    # the -1e20 masked_fill to inf/NaN in fp32 for padded batches when r >= 2 (a
    # property of the reference PyTorch code), so the padded demo uses r=1 where
    # the math is well defined.
    mask_pad = jnp.stack(
        [jnp.ones((T,), jnp.float32),
         jnp.concatenate([jnp.ones((5,), jnp.float32),
                          jnp.zeros((T - 5,), jnp.float32)])], axis=0)
    out2 = jax.block_until_ready(dsa_forward(x, mask_pad, w, b, dsa_r=1))
    ref2 = dsa_reference(x, mask_pad, w, b, dsa_r=1)
    assert jnp.allclose(out2, ref2, atol=TOL, rtol=TOL), \
        float(jnp.max(jnp.abs(out2 - ref2)))

    # Check 3: larger batch exercising batch padding (20 -> 24) and a multi-step
    # "parallel" grid (3 steps of bt=8) with constant-index weight blocks.
    B3 = 20
    x3 = jax.random.normal(kx2, (B3, T, Din), dtype=jnp.float32)
    mask_full3 = jnp.ones((B3, T), jnp.float32)
    out3 = jax.block_until_ready(
        dsa_forward(x3, mask_full3, w, b, dsa_r=3, block_b=8))
    ref3 = dsa_reference(x3, mask_full3, w, b, dsa_r=3)
    assert out3.shape == (B3, H * Ddim), out3.shape
    assert jnp.allclose(out3, ref3, atol=TOL, rtol=TOL), \
        float(jnp.max(jnp.abs(out3 - ref3)))

    print("KERNEL_OK")
</pallas_src>

<mosaic_0001>
module attributes {stable_mosaic.version = 11 : i64} {
  func.func @_dsa_kernel(%arg0: i32, %arg1: memref<8x8x32xf32, #tpu.memory_space<vmem>>, %arg2: memref<8x8x1xf32, #tpu.memory_space<vmem>>, %arg3: memref<32x128xf32, #tpu.memory_space<vmem>>, %arg4: memref<1x128xf32, #tpu.memory_space<vmem>>, %arg5: memref<4x128xf32, #tpu.memory_space<vmem>>, %arg6: memref<128x4xf32, #tpu.memory_space<vmem>>, %arg7: memref<8x128xf32, #tpu.memory_space<vmem>>) attributes {dimension_semantics = [#tpu.dimension_semantics<parallel>], iteration_bounds = array<i64: 1>, scalar_prefetch = 0 : i64, scratch_operands = 0 : i64, tpu.core_type = #tpu.core_type<tc>, window_params = [{transform_indices = @transform_0, window_bounds = array<i64: 8, 8, 32>}, {transform_indices = @transform_1, window_bounds = array<i64: 8, 8, 1>}, {pipeline_mode = #tpu.pipeline_mode<synchronous>, transform_indices = @transform_2, window_bounds = array<i64: 32, 128>}, {pipeline_mode = #tpu.pipeline_mode<synchronous>, transform_indices = @transform_3, window_bounds = array<i64: 1, 128>}, {pipeline_mode = #tpu.pipeline_mode<synchronous>, transform_indices = @transform_4, window_bounds = array<i64: 4, 128>}, {pipeline_mode = #tpu.pipeline_mode<synchronous>, transform_indices = @transform_5, window_bounds = array<i64: 128, 4>}, {transform_indices = @transform_6, window_bounds = array<i64: 8, 128>}]} {
    %c0 = arith.constant 0 : index
    %c0_0 = arith.constant 0 : index
    %c0_1 = arith.constant 0 : index
    %0 = vector.load %arg1[%c0, %c0_0, %c0_1] : memref<8x8x32xf32, #tpu.memory_space<vmem>>, vector<8x8x32xf32>
    %1 = vector.shape_cast %0 : vector<8x8x32xf32> to vector<64x32xf32>
    %c0_2 = arith.constant 0 : index
    %c0_3 = arith.constant 0 : index
    %c0_4 = arith.constant 0 : index
    %2 = vector.load %arg2[%c0_2, %c0_3, %c0_4] : memref<8x8x1xf32, #tpu.memory_space<vmem>>, vector<8x8x1xf32>
    %c0_5 = arith.constant 0 : index
    %c0_6 = arith.constant 0 : index
    %3 = vector.load %arg3[%c0_5, %c0_6] : memref<32x128xf32, #tpu.memory_space<vmem>>, vector<32x128xf32>
    %c0_7 = arith.constant 0 : index
    %c0_8 = arith.constant 0 : index
    %4 = vector.load %arg4[%c0_7, %c0_8] : memref<1x128xf32, #tpu.memory_space<vmem>>, vector<1x128xf32>
    %c0_9 = arith.constant 0 : index
    %c0_10 = arith.constant 0 : index
    %5 = vector.load %arg5[%c0_9, %c0_10] : memref<4x128xf32, #tpu.memory_space<vmem>>, vector<4x128xf32>
    %c0_11 = arith.constant 0 : index
    %c0_12 = arith.constant 0 : index
    %6 = vector.load %arg6[%c0_11, %c0_12] : memref<128x4xf32, #tpu.memory_space<vmem>>, vector<128x4xf32>
    %cst = arith.constant dense<0.000000e+00> : vector<64x128xf32>
    %7 = tpu.matmul %1, %3, %cst {dimension_numbers = #tpu.dot_dimension_numbers<[1], [0], [0], [1], [0, 0, 1, 1], [], []>, precision = #tpu.contract_precision<fp32>} : vector<64x32xf32>, vector<32x128xf32>, vector<64x128xf32> -> vector<64x128xf32>
    %8 = vector.broadcast %4 : vector<1x128xf32> to vector<64x128xf32>
    %9 = arith.addf %7, %8 : vector<64x128xf32>
    %cst_13 = arith.constant 0.000000e+00 : f32
    %10 = vector.broadcast %cst_13 : f32 to vector<64x128xf32>
    %11 = arith.cmpf oge, %9, %10 : vector<64x128xf32>
    %cst_14 = arith.constant 0.00999999977 : f32
    %12 = vector.broadcast %cst_14 : f32 to vector<64x128xf32>
    %13 = arith.mulf %12, %9 : vector<64x128xf32>
    %14 = arith.select %11, %9, %13 : vector<64x128xi1>, vector<64x128xf32>
    %15 = vector.shape_cast %14 : vector<64x128xf32> to vector<8x8x128xf32>
    %16 = vector.shape_cast %2 : vector<8x8x1xf32> to vector<8x8x1xf32>
    %17 = vector.broadcast %16 : vector<8x8x1xf32> to vector<8x8x4xf32>
    %cst_15 = arith.constant 0.000000e+00 : f32
    %18 = vector.broadcast %cst_15 : f32 to vector<8x8x4xf32>
    %19 = arith.cmpf oeq, %17, %18 : vector<8x8x4xf32>
    %cst_16 = arith.constant -1.000000e+20 : f32
    %20 = vector.broadcast %cst_16 : f32 to vector<8x8x4xf32>
    %21 = arith.select %19, %20, %17 : vector<8x8x4xi1>, vector<8x8x4xf32>
    %cst_17 = arith.constant 0.000000e+00 : f32
    %22 = vector.broadcast %cst_17 : f32 to vector<8x8x4xf32>
    %23 = arith.mulf %22, %21 : vector<8x8x4xf32>
    %cst_18 = arith.constant dense<0xFF800000> : vector<8x4xf32>
    %24 = vector.multi_reduction <maximumf>, %23, %cst_18 [1] : vector<8x8x4xf32> to vector<8x4xf32>
    %25 = vector.shape_cast %24 : vector<8x4xf32> to vector<8x1x4xf32>
    %26 = vector.broadcast %25 : vector<8x1x4xf32> to vector<8x8x4xf32>
    %27 = arith.subf %23, %26 : vector<8x8x4xf32>
    %28 = math.exp %27 : vector<8x8x4xf32>
    %cst_19 = arith.constant dense<0.000000e+00> : vector<8x4xf32>
    %29 = vector.multi_reduction <add>, %28, %cst_19 [1] : vector<8x8x4xf32> to vector<8x4xf32>
    %30 = vector.shape_cast %29 : vector<8x4xf32> to vector<8x1x4xf32>
    %cst_20 = arith.constant 1.000000e+00 : f32
    %31 = vector.broadcast %cst_20 : f32 to vector<8x1x4xf32>
    %32 = arith.divf %31, %30 : vector<8x1x4xf32>
    %33 = vector.broadcast %32 : vector<8x1x4xf32> to vector<8x8x4xf32>
    %34 = arith.mulf %28, %33 : vector<8x8x4xf32>
    %35 = arith.mulf %34, %17 : vector<8x8x4xf32>
    %36 = vector.shape_cast %35 : vector<8x8x4xf32> to vector<64x4xf32>
    %cst_21 = arith.constant dense<0.000000e+00> : vector<64x128xf32>
    %37 = tpu.matmul %36, %5, %cst_21 {dimension_numbers = #tpu.dot_dimension_numbers<[1], [0], [0], [1], [0, 0, 1, 1], [], []>} : vector<64x4xf32>, vector<4x128xf32>, vector<64x128xf32> -> vector<64x128xf32>
    %38 = vector.shape_cast %37 : vector<64x128xf32> to vector<8x8x128xf32>
    %39 = arith.mulf %38, %15 : vector<8x8x128xf32>
    %cst_22 = arith.constant dense<0.000000e+00> : vector<8x128xf32>
    %40 = vector.multi_reduction <add>, %39, %cst_22 [1] : vector<8x8x128xf32> to vector<8x128xf32>
    %41 = vector.shape_cast %40 : vector<8x128xf32> to vector<8x1x128xf32>
    %42 = math.tanh %41 : vector<8x1x128xf32>
    %43 = vector.broadcast %42 : vector<8x1x128xf32> to vector<8x8x128xf32>
    %44 = arith.mulf %15, %43 : vector<8x8x128xf32>
    %45 = vector.shape_cast %44 : vector<8x8x128xf32> to vector<64x128xf32>
    %cst_23 = arith.constant dense<0.000000e+00> : vector<64x4xf32>
    %46 = tpu.matmul %45, %6, %cst_23 {dimension_numbers = #tpu.dot_dimension_numbers<[1], [0], [0], [1], [0, 0, 1, 1], [], []>} : vector<64x128xf32>, vector<128x4xf32>, vector<64x4xf32> -> vector<64x4xf32>
    %47 = vector.shape_cast %46 : vector<64x4xf32> to vector<8x8x4xf32>
    %48 = arith.addf %23, %47 : vector<8x8x4xf32>
    %49 = arith.mulf %48, %21 : vector<8x8x4xf32>
    %cst_24 = arith.constant dense<0xFF800000> : vector<8x4xf32>
    %50 = vector.multi_reduction <maximumf>, %49, %cst_24 [1] : vector<8x8x4xf32> to vector<8x4xf32>
    %51 = vector.shape_cast %50 : vector<8x4xf32> to vector<8x1x4xf32>
    %52 = vector.broadcast %51 : vector<8x1x4xf32> to vector<8x8x4xf32>
    %53 = arith.subf %49, %52 : vector<8x8x4xf32>
    %54 = math.exp %53 : vector<8x8x4xf32>
    %cst_25 = arith.constant dense<0.000000e+00> : vector<8x4xf32>
    %55 = vector.multi_reduction <add>, %54, %cst_25 [1] : vector<8x8x4xf32> to vector<8x4xf32>
    %56 = vector.shape_cast %55 : vector<8x4xf32> to vector<8x1x4xf32>
    %cst_26 = arith.constant 1.000000e+00 : f32
    %57 = vector.broadcast %cst_26 : f32 to vector<8x1x4xf32>
    %58 = arith.divf %57, %56 : vector<8x1x4xf32>
    %59 = vector.broadcast %58 : vector<8x1x4xf32> to vector<8x8x4xf32>
    %60 = arith.mulf %54, %59 : vector<8x8x4xf32>
    %61 = arith.mulf %60, %17 : vector<8x8x4xf32>
    %62 = vector.shape_cast %61 : vector<8x8x4xf32> to vector<64x4xf32>
    %cst_27 = arith.constant dense<0.000000e+00> : vector<64x128xf32>
    %63 = tpu.matmul %62, %5, %cst_27 {dimension_numbers = #tpu.dot_dimension_numbers<[1], [0], [0], [1], [0, 0, 1, 1], [], []>} : vector<64x4xf32>, vector<4x128xf32>, vector<64x128xf32> -> vector<64x128xf32>
    %64 = vector.shape_cast %63 : vector<64x128xf32> to vector<8x8x128xf32>
    %65 = arith.mulf %64, %15 : vector<8x8x128xf32>
    %cst_28 = arith.constant dense<0.000000e+00> : vector<8x128xf32>
    %66 = vector.multi_reduction <add>, %65, %cst_28 [1] : vector<8x8x128xf32> to vector<8x128xf32>
    %67 = vector.shape_cast %66 : vector<8x128xf32> to vector<8x1x128xf32>
    %68 = math.tanh %67 : vector<8x1x128xf32>
    %69 = vector.broadcast %68 : vector<8x1x128xf32> to vector<8x8x128xf32>
    %70 = arith.mulf %15, %69 : vector<8x8x128xf32>
    %71 = vector.shape_cast %70 : vector<8x8x128xf32> to vector<64x128xf32>
    %cst_29 = arith.constant dense<0.000000e+00> : vector<64x4xf32>
    %72 = tpu.matmul %71, %6, %cst_29 {dimension_numbers = #tpu.dot_dimension_numbers<[1], [0], [0], [1], [0, 0, 1, 1], [], []>} : vector<64x128xf32>, vector<128x4xf32>, vector<64x4xf32> -> vector<64x4xf32>
    %73 = vector.shape_cast %72 : vector<64x4xf32> to vector<8x8x4xf32>
    %74 = arith.addf %49, %73 : vector<8x8x4xf32>
    %75 = arith.mulf %74, %21 : vector<8x8x4xf32>
    %cst_30 = arith.constant dense<0xFF800000> : vector<8x4xf32>
    %76 = vector.multi_reduction <maximumf>, %75, %cst_30 [1] : vector<8x8x4xf32> to vector<8x4xf32>
    %77 = vector.shape_cast %76 : vector<8x4xf32> to vector<8x1x4xf32>
    %78 = vector.broadcast %77 : vector<8x1x4xf32> to vector<8x8x4xf32>
    %79 = arith.subf %75, %78 : vector<8x8x4xf32>
    %80 = math.exp %79 : vector<8x8x4xf32>
    %cst_31 = arith.constant dense<0.000000e+00> : vector<8x4xf32>
    %81 = vector.multi_reduction <add>, %80, %cst_31 [1] : vector<8x8x4xf32> to vector<8x4xf32>
    %82 = vector.shape_cast %81 : vector<8x4xf32> to vector<8x1x4xf32>
    %cst_32 = arith.constant 1.000000e+00 : f32
    %83 = vector.broadcast %cst_32 : f32 to vector<8x1x4xf32>
    %84 = arith.divf %83, %82 : vector<8x1x4xf32>
    %85 = vector.broadcast %84 : vector<8x1x4xf32> to vector<8x8x4xf32>
    %86 = arith.mulf %80, %85 : vector<8x8x4xf32>
    %87 = arith.mulf %86, %17 : vector<8x8x4xf32>
    %88 = vector.shape_cast %87 : vector<8x8x4xf32> to vector<64x4xf32>
    %cst_33 = arith.constant dense<0.000000e+00> : vector<64x128xf32>
    %89 = tpu.matmul %88, %5, %cst_33 {dimension_numbers = #tpu.dot_dimension_numbers<[1], [0], [0], [1], [0, 0, 1, 1], [], []>} : vector<64x4xf32>, vector<4x128xf32>, vector<64x128xf32> -> vector<64x128xf32>
    %90 = vector.shape_cast %89 : vector<64x128xf32> to vector<8x8x128xf32>
    %91 = arith.mulf %90, %15 : vector<8x8x128xf32>
    %cst_34 = arith.constant dense<0.000000e+00> : vector<8x128xf32>
    %92 = vector.multi_reduction <add>, %91, %cst_34 [1] : vector<8x8x128xf32> to vector<8x128xf32>
    %93 = vector.shape_cast %92 : vector<8x128xf32> to vector<8x1x128xf32>
    %94 = math.tanh %93 : vector<8x1x128xf32>
    %95 = vector.shape_cast %94 : vector<8x1x128xf32> to vector<8x128xf32>
    %c0_35 = arith.constant 0 : index
    %c0_36 = arith.constant 0 : index
    %96 = vector.load %arg7[%c0_35, %c0_36] : memref<8x128xf32, #tpu.memory_space<vmem>>, vector<8x128xf32>
    tpu.vector_store %arg7[%c0_35, %c0_36], %95 {strides = array<i32>} : memref<8x128xf32, #tpu.memory_space<vmem>>, vector<8x128xf32>,
    return
  }
  func.func @transform_0(%arg0: i32) -> (i32, i32, i32) {
    %c0_i32 = arith.constant 0 : i32
    %c0_i32_0 = arith.constant 0 : i32
    %c0_i32_1 = arith.constant 0 : i32
    return %arg0, %c0_i32, %c0_i32_0 : i32, i32, i32
  }
  func.func @transform_1(%arg0: i32) -> (i32, i32, i32) {
    %c0_i32 = arith.constant 0 : i32
    %c0_i32_0 = arith.constant 0 : i32
    %c0_i32_1 = arith.constant 0 : i32
    return %arg0, %c0_i32, %c0_i32_0 : i32, i32, i32
  }
  func.func @transform_2(%arg0: i32) -> (i32, i32) {
    %c0_i32 = arith.constant 0 : i32
    %c0_i32_0 = arith.constant 0 : i32
    %c0_i32_1 = arith.constant 0 : i32
    return %c0_i32, %c0_i32_0 : i32, i32
  }
  func.func @transform_3(%arg0: i32) -> (i32, i32) {
    %c0_i32 = arith.constant 0 : i32
    %c0_i32_0 = arith.constant 0 : i32
    %c0_i32_1 = arith.constant 0 : i32
    return %c0_i32, %c0_i32_0 : i32, i32
  }
  func.func @transform_4(%arg0: i32) -> (i32, i32) {
    %c0_i32 = arith.constant 0 : i32
    %c0_i32_0 = arith.constant 0 : i32
    %c0_i32_1 = arith.constant 0 : i32
    return %c0_i32, %c0_i32_0 : i32, i32
  }
  func.func @transform_5(%arg0: i32) -> (i32, i32) {
    %c0_i32 = arith.constant 0 : i32
    %c0_i32_0 = arith.constant 0 : i32
    %c0_i32_1 = arith.constant 0 : i32
    return %c0_i32, %c0_i32_0 : i32, i32
  }
  func.func @transform_6(%arg0: i32) -> (i32, i32) {
    %c0_i32 = arith.constant 0 : i32
    %c0_i32_0 = arith.constant 0 : i32
    return %arg0, %c0_i32 : i32, i32
  }
}

</mosaic_0001>

<bundles_post_ra>
// kernel: tpu_custom_call.1
= control target key start
LH: loop header
LB: loop body
LE: loop exit
PB: predicated region body
PF: predicated region fallthrough
CT: control target
= control target key end

     0   :  { %v2938_v2 = vmov 0   ;;  %vm68_vm0 = vcmask 261120   ;;  %s3761_s0 = inlined_call_operand.vmem [shape: f32[8,8,32], index: 0, kind: input, shape index: {}]   ;;  %s3762_s1 = inlined_call_operand.vmem [shape: f32[8,8,1], index: 1, kind: input, shape index: {}]   ;;  %s3763_s2 = inlined_call_operand.vmem [shape: f32[32,128], index: 2, kind: input, shape index: {}]   ;;  %s3764_s3 = inlined_call_operand.vmem [shape: f32[1,128], index: 3, kind: input, shape index: {}]   ;;  %s3765_s4 = inlined_call_operand.vmem [shape: f32[4,128], index: 4, kind: input, shape index: {}]   ;;  %s3766_s5 = inlined_call_operand.vmem [shape: f32[128,4], index: 5, kind: input, shape index: {}]   ;;  %s3767_s6 = inlined_call_operand.hbm [shape: f32[8,128], index: 6, kind: output, shape index: {}]  }
   0x1   :  { %v34_v0 = vld [vmem:[%s3762_s1 + $0x10] sm:$0xff]  ;;  %v32_v1 = vld [vmem:[%s3762_s1] sm:$0xff]  ;;  %2771 = vset.pattern.permute.xlu1 %v2938_v2  ;;  %2770 = vset.pattern.permute.xlu0 %v2938_v2  ;;  %v35_v3 = vld [vmem:[%s3762_s1 + $0x18] sm:$0xff] }
   0x2   :  { %915 = vperm.xlu1 %2771, %v34_v0   ;;  %905 = vperm.xlu0 %2770, %v32_v1   ;;  %v33_v4 = vld [vmem:[%s3762_s1 + $0x8] sm:$0xff]  ;;  %v43_v5 = vld [vmem:[%s3763_s2 + $0x18] sm:$0xff]  ;;  %v42_v7 = vld [vmem:[%s3763_s2 + $0x10] sm:$0xff] }
   0x3   :  { %v2990_v6 = vand.u32 4294901760, %v43_v5  ;;  %v41_v8 = vld [vmem:[%s3763_s2 + $0x8] sm:$0xff]  ;;  %v40_v9 = vld [vmem:[%s3763_s2] sm:$0xff]  ;;  %v3001_v10 = vand.u32 4294901760, %v42_v7  ;;  %v30_v15 = vld [vmem:[%s3761_s0 + $0x30] sm:$0xff] }
   0x4   :  { %v3003_v11 = vand.u32 4294901760, %v41_v8  ;;  %v3005_v12 = vand.u32 4294901760, %v40_v9  ;;  %v28_v13 = vld [vmem:[%s3761_s0 + $0x20] sm:$0xff]  ;;  %v29_v14 = vld [vmem:[%s3761_s0 + $0x28] sm:$0xff]  ;;  %v88_v19 = vsel %vm68_vm0, %v30_v15, 0  ;;  %v31_v20 = vld [vmem:[%s3761_s0 + $0x38] sm:$0xff] }
   0x5   :  { %2760 = vmatprep.subr.mxu1 %v2990_v6  ;;  %v82_v16 = vsel %vm68_vm0, %v28_v13, 0  ;;  %v85_v17 = vsel %vm68_vm0, %v29_v14, 0  ;;  %v3020_v18 = vsub.f32 %v43_v5, %v2990_v6  ;;  %2510 = vmatprep.subr.mxu0 %v2990_v6  ;;  %v3032_v23 = vsub.f32 %v42_v7, %v3001_v10  ;;  %v37_v25 = vld [vmem:[%s3762_s1 + $0x28] sm:$0xff]  ;;  %v36_v26 = vld [vmem:[%s3762_s1 + $0x20] sm:$0xff] }
   0x6   :  { %920 = vperm.xlu1 %2771, %v35_v3   ;;  %910 = vperm.xlu0 %2770, %v33_v4   ;;  %v3027_v21 = vand.u32 4294901760, %v82_v16  ;;  %v3029_v22 = vand.u32 4294901760, %v85_v17  ;;  %v3034_v24 = vand.u32 4294901760, %v88_v19  ;;  %v91_v28 = vsel %vm68_vm0, %v31_v20, 0 }
   0x7   :  { %2764 = vmatpush3.msra.mxu1 %v2990_v6  ;;  %v3044_v27 = vand.u32 4294901760, %v3020_v18  ;;  %v3048_v29 = vsub.f32 %v41_v8, %v3003_v11  ;;  %v3051_v30 = vsub.f32 %v40_v9, %v3005_v12  ;;  %2511 = vmatpush3.msra.mxu0 %v2990_v6 }
   0x8   :  { %11 = vsyncpa [#allocation3], 0  ;;  %2761 = vmatprep.subr.mxu1 %v3001_v10  ;;  %v3056_v31 = vsub.f32 %v82_v16, %v3027_v21  ;;  %v3059_v32 = vsub.f32 %v85_v17, %v3029_v22  ;;  %v3062_v33 = vand.u32 4294901760, %v3032_v23  ;;  %v3065_v34 = vsub.f32 %v88_v19, %v3034_v24  ;;  %2512 = vmatprep.subr.mxu0 %v3001_v10  ;;  %v24_v43 = vld [vmem:[%s3761_s0] sm:$0xff]  ;;  %v39_v44 = vld [vmem:[%s3762_s1 + $0x38] sm:$0xff] }
   0x9   :  { %2765 = vmatpush3.msra.mxu1 %v3001_v10  ;;  %v270_v35 = vsub.f32 %v3020_v18, %v3044_v27  ;;  %v3071_v36 = vand.u32 4294901760, %v91_v28  ;;  %v3074_v37 = vand.u32 4294901760, %v3048_v29  ;;  %v3077_v38 = vand.u32 4294901760, %v3051_v30  ;;  %2513 = vmatpush3.msra.mxu0 %v3001_v10  ;;  %v38_v45 = vld [vmem:[%s3762_s1 + $0x30] sm:$0xff]  ;;  %v25_v52 = vld [vmem:[%s3761_s0 + $0x8] sm:$0xff]  ;;  %v27_v54 = vld [vmem:[%s3761_s0 + $0x18] sm:$0xff] }
   0xa   :  { %930 = vperm.xlu1 %2771, %v37_v25   ;;  %925 = vperm.xlu0 %2770, %v36_v26   ;;  %v204_v39 = vand.u32 4294901760, %v3056_v31  ;;  %v214_v40 = vand.u32 4294901760, %v3059_v32  ;;  %v277_v41 = vsub.f32 %v3032_v23, %v3062_v33  ;;  %v224_v42 = vand.u32 4294901760, %v3065_v34  ;;  %v26_v53 = vld [vmem:[%s3761_s0 + $0x10] sm:$0xff] }
   0xb   :  { %2762 = vmatprep.subr.mxu1 %v3003_v11  ;;  %v3096_v46 = vsub.f32 %v91_v28, %v3071_v36  ;;  %v284_v47 = vsub.f32 %v3048_v29, %v3074_v37  ;;  %2514 = vmatprep.subr.mxu0 %v3003_v11  ;;  %v271_v50 = vand.u32 4294901760, %v270_v35  ;;  %v291_v57 = vsub.f32 %v3051_v30, %v3077_v38 }
   0xc   :  { %2766 = vmatpush3.msra.mxu1 %v3003_v11  ;;  %v205_v48 = vsub.f32 %v3056_v31, %v204_v39  ;;  %v215_v49 = vsub.f32 %v3059_v32, %v214_v40  ;;  %v225_v51 = vsub.f32 %v3065_v34, %v224_v42  ;;  %2515 = vmatpush3.msra.mxu0 %v3003_v11  ;;  %v278_v55 = vand.u32 4294901760, %v277_v41 }
   0xd   :  { %2763 = vmatprep.subr.mxu1 %v3005_v12  ;;  %v234_v56 = vand.u32 4294901760, %v3096_v46  ;;  %v70_v58 = vsel %vm68_vm0, %v24_v43, 0  ;;  %2516 = vmatprep.subr.mxu0 %v3005_v12  ;;  %v73_v0 = vsel %vm68_vm0, %v25_v52, 0  ;;  %v76_v1 = vsel %vm68_vm0, %v26_v53, 0 }
   0xe   :  { %940 = vperm.xlu1 %2771, %v39_v44   ;;  %935 = vperm.xlu0 %2770, %v38_v45   ;;  %v206_v59 = vand.u32 4294901760, %v205_v48  ;;  %v216_v60 = vand.u32 4294901760, %v215_v49  ;;  %v226_v61 = vand.u32 4294901760, %v225_v51  ;;  %v3127_v62 = vand.u32 4294901760, %v70_v58 }
   0xf   :  { %2767 = vmatpush3.msra.mxu1 %v3005_v12  ;;  %v235_v63 = vsub.f32 %v3096_v46, %v234_v56  ;;  %v79_v2 = vsel %vm68_vm0, %v27_v54, 0  ;;  %2517 = vmatpush3.msra.mxu0 %v3005_v12  ;;  %v3137_v3 = vand.u32 4294901760, %v73_v0  ;;  %v3139_v4 = vand.u32 4294901760, %v76_v1 }
  0x10   :  { %2524 = vmatprep.mubr.f32.mxu1 %v206_v59  ;;  %2530 = vmatprep.subr.mxu1 %v271_v50  ;;  %v3141_v5 = vand.u32 4294901760, %v79_v2  ;;  %v163_v7 = vsub.f32 %v70_v58, %v3127_v62  ;;  %v285_v9 = vand.u32 4294901760, %v284_v47  ;;  %v292_v17 = vand.u32 4294901760, %v291_v57 }
  0x11   :  { %2525 = vmatmul.mubr.f32.vlgmr.msra.gmra.mxu1 %v216_v60  ;;  %v236_v8 = vand.u32 4294901760, %v235_v63  ;;  %2550 = vmatprep.subr.mxu0 %v3020_v18  ;;  %v173_v14 = vsub.f32 %v73_v0, %v3137_v3  ;;  %v183_v15 = vsub.f32 %v76_v1, %v3139_v4  ;;  %vm1144_vm1 = vcmask 1043456  }
  0x12   :  { %2531 = vmatpush3.msra.mxu1 %v271_v50  ;;  %2527 = vmatprep.mubr.f32.mxu1 %v226_v61  ;;  %v164_v13 = vand.u32 4294901760, %v163_v7  ;;  %v193_v16 = vsub.f32 %v79_v2, %v3141_v5  ;;  %vm1119_vm10 = vcmask 31744  }
  0x13   :  { %2532 = vmatprep.subr.mxu1 %v278_v55  ;;  %v174_v20 = vand.u32 4294901760, %v173_v14  ;;  %v184_v25 = vand.u32 4294901760, %v183_v15 }
  0x14   :  { %2533 = vmatpush3.msra.mxu1 %v278_v55  ;;  %v165_v19 = vsub.f32 %v163_v7, %v164_v13  ;;  %v194_v26 = vand.u32 4294901760, %v193_v16 }
  0x15   :  { %2528 = vmatmul.mubr.f32.gmra.mxu1 %v236_v8  ;;  %2534 = vmatprep.subr.mxu1 %v285_v9  ;;  %v175_v35 = vsub.f32 %v173_v14, %v174_v20  ;;  %v185_v41 = vsub.f32 %v183_v15, %v184_v25 }
  0x16   :  { %2535 = vmatpush3.msra.mxu1 %v285_v9  ;;  %2538 = vmatprep.mubr.f32.mxu1 %v3127_v62  ;;  %v166_v28 = vand.u32 4294901760, %v165_v19  ;;  %v195_v43 = vsub.f32 %v193_v16, %v194_v26 }
  0x17   :  { %2536 = vmatprep.subr.mxu1 %v292_v17  ;;  %v176_v44 = vand.u32 4294901760, %v175_v35  ;;  %v186_v45 = vand.u32 4294901760, %v185_v41 }
  0x18   :  { %2537 = vmatpush3.msra.mxu1 %v292_v17  ;;  %2518 = vmatprep.mubr.f32.mxu0 %v166_v28  ;;  %v196_v47 = vand.u32 4294901760, %v195_v43 }
  0x19   :  { %2539 = vmatmul.mubr.f32.vlgmr.msra.gmra.mxu1 %v3137_v3  ;;  %2570 = vmatprep.subr.mxu1 %v2990_v6 }
  0x1a   :  { %2541 = vmatprep.mubr.f32.mxu1 %v3139_v4  ;;  %2519 = vmatmul.mubr.f32.vlgmr.msra.gmra.mxu0 %v176_v44 }
  0x1b   :  { %2551 = vmatpush3.msra.mxu0 %v3020_v18  ;;  %2521 = vmatprep.mubr.f32.mxu0 %v186_v45 }
  0x1c   :  { %2552 = vmatprep.subr.mxu0 %v3032_v23  ;;  %2571 = vmatpush3.msra.mxu1 %v2990_v6 }
  0x1d   :  { %2542 = vmatmul.mubr.f32.gmra.mxu1 %v3141_v5  ;;  %2553 = vmatpush3.msra.mxu0 %v3032_v23 }
  0x1e   :  { %2544 = vmatprep.mubr.f32.mxu1 %v3027_v21  ;;  %2522 = vmatmul.mubr.f32.gmra.mxu0 %v196_v47 }
  0x1f   :  { %2554 = vmatprep.subr.mxu0 %v3048_v29  ;;  %2572 = vmatprep.subr.mxu1 %v3001_v10 }
  0x20   :  { %2555 = vmatpush3.msra.mxu0 %v3048_v29  ;;  %2573 = vmatpush3.msra.mxu1 %v3001_v10 }
  0x21   :  { %2545 = vmatmul.mubr.f32.gmra.mxu1 %v3029_v22  ;;  %2556 = vmatprep.subr.mxu0 %v3051_v30 }
  0x22   :  { %2547 = vmatprep.mubr.f32.mxu1 %v3034_v24  ;;  %2574 = vmatprep.subr.mxu1 %v3003_v11 }
  0x23   :  { %2557 = vmatpush3.msra.mxu0 %v3051_v30  ;;  %2558 = vmatprep.mubr.f32.mxu0 %v163_v7 }
  0x24   :  { %2575 = vmatpush3.msra.mxu1 %v3003_v11  ;;  %2559 = vmatmul.mubr.f32.vlgmr.msra.gmra.mxu0 %v173_v14 }
  0x25   :  { %2548 = vmatmul.mubr.f32.gmra.mxu1 %v3071_v36  ;;  %2576 = vmatprep.subr.mxu1 %v3005_v12 }
  0x26   :  { %2577 = vmatpush3.msra.mxu1 %v3005_v12  ;;  %2578 = vmatprep.mubr.f32.mxu1 %v164_v13 }
  0x27   :  { %2561 = vmatprep.mubr.f32.mxu0 %v183_v15  ;;  %2590 = vmatprep.subr.mxu0 %v3044_v27 }
  0x28   :  { %2562 = vmatmul.mubr.f32.gmra.mxu0 %v193_v16  ;;  %2610 = vmatprep.subr.mxu1 %v2990_v6 }
  0x29   :  { %2579 = vmatmul.mubr.f32.vlgmr.msra.gmra.mxu1 %v174_v20  ;;  %2564 = vmatprep.mubr.f32.mxu0 %v3056_v31 }
  0x2a   :  { %2581 = vmatprep.mubr.f32.mxu1 %v184_v25  ;;  %2591 = vmatpush3.msra.mxu0 %v3044_v27 }
  0x2b   :  { %2592 = vmatprep.subr.mxu0 %v3062_v33  ;;  %2611 = vmatpush3.msra.mxu1 %v2990_v6  ;;  %v3217_v6 = vld [vmem:[%s3765_s4] sm:$0xf] }
  0x2c   :  { %2565 = vmatmul.mubr.f32.gmra.mxu0 %v3059_v32  ;;  %2612 = vmatprep.subr.mxu1 %v3001_v10 }
  0x2d   :  { %2582 = vmatmul.mubr.f32.gmra.mxu1 %v194_v26  ;;  %2567 = vmatprep.mubr.f32.mxu0 %v3065_v34 }
  0x2e   :  { %2584 = vmatprep.mubr.f32.mxu1 %v204_v39  ;;  %2593 = vmatpush3.msra.mxu0 %v3062_v33 }
  0x2f   :  { %2594 = vmatprep.subr.mxu0 %v3074_v37  ;;  %2613 = vmatpush3.msra.mxu1 %v3001_v10 }
  0x30   :  { %2568 = vmatmul.mubr.f32.gmra.mxu0 %v3096_v46  ;;  %2614 = vmatprep.subr.mxu1 %v3003_v11 }
  0x31   :  { %2585 = vmatmul.mubr.f32.gmra.mxu1 %v214_v40  ;;  %2595 = vmatpush3.msra.mxu0 %v3074_v37 }
  0x32   :  { %2587 = vmatprep.mubr.f32.mxu1 %v224_v42  ;;  %2596 = vmatprep.subr.mxu0 %v3077_v38 }
  0x33   :  { %2597 = vmatpush3.msra.mxu0 %v3077_v38  ;;  %2598 = vmatprep.mubr.f32.mxu0 %v3127_v62 }
  0x34   :  { %2615 = vmatpush3.msra.mxu1 %v3003_v11  ;;  %2599 = vmatmul.mubr.f32.vlgmr.msra.gmra.mxu0 %v3137_v3 }
  0x35   :  { %2588 = vmatmul.mubr.f32.gmra.mxu1 %v234_v56  ;;  %2616 = vmatprep.subr.mxu1 %v3005_v12 }
  0x36   :  { %2617 = vmatpush3.msra.mxu1 %v3005_v12  ;;  %2618 = vmatprep.mubr.f32.mxu1 %v3127_v62 }
  0x37   :  { %2601 = vmatprep.mubr.f32.mxu0 %v3139_v4  ;;  %2630 = vmatprep.subr.msk.mxu0 %vm1144_vm1, %v3217_v6 }
  0x38   :  { %2602 = vmatmul.mubr.f32.gmra.mxu0 %v3141_v5 }
  0x39   :  { %2619 = vmatmul.mubr.f32.vlgmr.msra.gmra.mxu1 %v3137_v3  ;;  %2604 = vmatprep.mubr.f32.mxu0 %v3027_v21 }
  0x3a   :  { %2621 = vmatprep.mubr.f32.mxu1 %v3139_v4  ;;  %2631 = vmatpush3.msk.msra.mxu0 %vm1144_vm1, %v3217_v6 }
  0x3b   :  { %2688 = vmatprep.subr.msk.mxu0 %vm1144_vm1, %v3217_v6 }
  0x3c   :  { %2605 = vmatmul.mubr.f32.gmra.mxu0 %v3029_v22 }
  0x3d   :  { %2622 = vmatmul.mubr.f32.gmra.mxu1 %v3141_v5  ;;  %2607 = vmatprep.mubr.f32.mxu0 %v3034_v24 }
  0x3e   :  { %2624 = vmatprep.mubr.f32.mxu1 %v3027_v21 }
  0x40   :  { %2608 = vmatmul.mubr.f32.gmra.mxu0 %v3071_v36 }
  0x41   :  { %2625 = vmatmul.mubr.f32.gmra.mxu1 %v3029_v22 }
  0x42   :  { %2627 = vmatprep.mubr.f32.mxu1 %v3034_v24 }
  0x45   :  { %2628 = vmatmul.mubr.f32.gmra.mxu1 %v3071_v36 }
  0x7d   :  { %v3226_v10 = vpop.permute.xlu1 %915  ;;  %v3228_v11 = vpop.permute.xlu0 %905 }
  0x7e   :  { %3829 = vst [vmem:[#allocation5_spill] sm:$0xff] %v3226_v10  ;;  %3830 = vst [vmem:[#allocation6_spill] sm:$0xff] %v3228_v11  ;;  %vm945_vm2 = vcmp.eq.f32.partialorder %v3226_v10, 0.0  ;;  %vm943_vm3 = vcmp.eq.f32.partialorder %v3228_v11, 0.0 }
  0x7f   :  { %v3233_v12 = vsel %vm945_vm2, -1e+20, %v3226_v10  ;;  %v3236_v18 = vsel %vm943_vm3, -1e+20, %v3228_v11 }
  0x80   :  { %3831 = vst [vmem:[#allocation7_spill] sm:$0xff] %v3233_v12  ;;  %v3239_v21 = vmul.f32 0.0, %v3233_v12  ;;  %v3242_v22 = vmul.f32 0.0, %v3236_v18 }
  0x81   :  { %v3244_v23 = vpop.permute.xlu1 %920  ;;  %v3246_v24 = vpop.permute.xlu0 %910 }
  0x82   :  { %3832 = vst [vmem:[#allocation8_spill] sm:$0xff] %v3244_v23  ;;  %3833 = vst [vmem:[#allocation9_spill] sm:$0xff] %v3246_v24  ;;  %v979_v27 = vrot.slane %v3239_v21, 4  ;;  %v967_v29 = vrot.slane %v3242_v22, 4  ;;  %vm946_vm4 = vcmp.eq.f32.partialorder %v3244_v23, 0.0  ;;  %vm944_vm5 = vcmp.eq.f32.partialorder %v3246_v24, 0.0 }
  0x83   :  { %v3253_v30 = vsel %vm946_vm4, -1e+20, %v3244_v23  ;;  %v3256_v31 = vsel %vm944_vm5, -1e+20, %v3246_v24  ;;  %vm2307_vm4 = vcmask 1042434   ;;  %vm2309_vm5 = vcmask 1043459  }
  0x84   :  { %v980_v32 = vmax.f32 %v3239_v21, %v979_v27  ;;  %v968_v33 = vmax.f32 %v3242_v22, %v967_v29  ;;  %v3261_v34 = vmul.f32 0.0, %v3253_v30  ;;  %v3264_v36 = vmul.f32 0.0, %v3256_v31 }
  0x85   :  { %v3266_v37 = vpop.permute.xlu1 %930  ;;  %v3268_v38 = vpop.permute.xlu0 %925 }
  0x86   :  { %3834 = vst [vmem:[#allocation10_spill] sm:$0xff] %v3266_v37  ;;  %3835 = vst [vmem:[#allocation11_spill] sm:$0xff] %v3268_v38  ;;  %v981_v39 = vrot.slane %v980_v32, 2  ;;  %v969_v40 = vrot.slane %v968_v33, 2  ;;  %v985_v42 = vrot.slane %v3261_v34, 4  ;;  %v973_v46 = vrot.slane %v3264_v36, 4 }
  0x87   :  { %vm948_vm6 = vcmp.eq.f32.partialorder %v3266_v37, 0.0  ;;  %vm947_vm7 = vcmp.eq.f32.partialorder %v3268_v38, 0.0 }
  0x88   :  { %v982_v48 = vmax.f32 %v980_v32, %v981_v39  ;;  %v970_v49 = vmax.f32 %v968_v33, %v969_v40  ;;  %v986_v50 = vmax.f32 %v3261_v34, %v985_v42  ;;  %v974_v51 = vmax.f32 %v3264_v36, %v973_v46 }
  0x89   :  { %v3277_v52 = vsel %vm948_vm6, -1e+20, %v3266_v37  ;;  %v3280_v53 = vsel %vm947_vm7, -1e+20, %v3268_v38  ;;  %v3282_v54 = vpop.permute.xlu1 %940  ;;  %v3284_v55 = vpop.permute.xlu0 %935  ;;  %vm2311_vm6 = vcmask 1044484   ;;  %vm2313_vm7 = vcmask 1045509  }
  0x8a   :  { %3836 = vst [vmem:[#allocation12_spill] sm:$0xff] %v3277_v52  ;;  %3837 = vst [vmem:[#allocation13_spill] sm:$0xff] %v3280_v53  ;;  %v983_v56 = vrot.slane %v982_v48, 1  ;;  %v971_v57 = vrot.slane %v970_v49, 1  ;;  %v987_v58 = vrot.slane %v986_v50, 2  ;;  %v975_v59 = vrot.slane %v974_v51, 2 }
  0x8b   :  { %3838 = vst [vmem:[#allocation14_spill] sm:$0xff] %v3282_v54  ;;  %3839 = vst [vmem:[#allocation15_spill] sm:$0xff] %v3284_v55  ;;  %v3287_v60 = vmul.f32 0.0, %v3277_v52  ;;  %v3290_v61 = vmul.f32 0.0, %v3280_v53  ;;  %vm950_vm8 = vcmp.eq.f32.partialorder %v3282_v54, 0.0  ;;  %vm949_vm9 = vcmp.eq.f32.partialorder %v3284_v55, 0.0 }
  0x8c   :  { %v984_v62 = vmax.f32 %v982_v48, %v983_v56  ;;  %v972_v63 = vmax.f32 %v970_v49, %v971_v57  ;;  %v988_v0 = vmax.f32 %v986_v50, %v987_v58  ;;  %v976_v1 = vmax.f32 %v974_v51, %v975_v59 }
  0x8d   :  { %3840 = vst [vmem:[#allocation16_spill] sm:$0xff] %v3287_v60  ;;  %3841 = vst [vmem:[#allocation17_spill] sm:$0xff] %v3290_v61  ;;  %v997_v2 = vrot.slane %v3287_v60, 4  ;;  %v991_v3 = vrot.slane %v3290_v61, 4  ;;  %v3297_v4 = vsel %vm950_vm8, -1e+20, %v3282_v54 }
  0x8e   :  { %3842 = vst [vmem:[#allocation18_spill] sm:$0xff] %v3297_v4  ;;  %v3300_v5 = vsel %vm949_vm9, -1e+20, %v3284_v55  ;;  %v1017_v7 = vsub.f32 %v3239_v21, %v984_v62  ;;  %v1015_v8 = vsub.f32 %v3242_v22, %v972_v63  ;;  %v989_v9 = vrot.slane %v988_v0, 1 }
  0x8f   :  { %3843 = vst [vmem:[#allocation19_spill] sm:$0xff] %v3300_v5  ;;  %v977_v13 = vrot.slane %v976_v1, 1  ;;  %v998_v14 = vmax.f32 %v3287_v60, %v997_v2  ;;  %v992_v15 = vmax.f32 %v3290_v61, %v991_v3  ;;  %v3307_v16 = vmul.f32 0.0, %v3297_v4 }
  0x90   :  { %v3310_v17 = vmul.f32 0.0, %v3300_v5  ;;  %v1027_v19 = vmul.f32 1.442695, %v1017_v7  ;;  %v1023_v20 = vmul.f32 1.442695, %v1015_v8  ;;  %v990_v25 = vmax.f32 %v988_v0, %v989_v9 }
  0x91   :  { %3844 = vst [vmem:[#allocation20_spill] sm:$0xff] %v3307_v16  ;;  %v978_v26 = vmax.f32 %v976_v1, %v977_v13  ;;  %v999_v28 = vrot.slane %v998_v14, 2  ;;  %v993_v35 = vrot.slane %v992_v15, 2  ;;  %v1009_v41 = vrot.slane %v3307_v16, 4 }
  0x92   :  { %3845 = vst [vmem:[#allocation21_spill] sm:$0xff] %v3310_v17  ;;  %v1003_v43 = vrot.slane %v3310_v17, 4  ;;  %2772 = vpow2.f32 %v1027_v19  ;;  %v1018_v44 = vsub.f32 %v3261_v34, %v990_v25  ;;  %vm2315_vm8 = vcmask 1046534  }
  0x93   :  { %v1016_v45 = vsub.f32 %v3264_v36, %v978_v26  ;;  %2774 = vpow2.f32 %v1023_v20  ;;  %v1000_v47 = vmax.f32 %v998_v14, %v999_v28  ;;  %v994_v27 = vmax.f32 %v992_v15, %v993_v35 }
  0x94   :  { %v1010_v29 = vmax.f32 %v3307_v16, %v1009_v41  ;;  %v1029_v32 = vmul.f32 1.442695, %v1018_v44  ;;  %v1004_v39 = vmax.f32 %v3310_v17, %v1003_v43  ;;  %vm2317_vm9 = vcmask 1047559  }
  0x95   :  { %v1025_v33 = vmul.f32 1.442695, %v1016_v45  ;;  %v1001_v40 = vrot.slane %v1000_v47, 1  ;;  %v995_v42 = vrot.slane %v994_v27, 1 }
  0x96   :  { %v1011_v46 = vrot.slane %v1010_v29, 2  ;;  %2776 = vpow2.f32 %v1029_v32  ;;  %v1005_v48 = vrot.slane %v1004_v39, 2 }
  0x97   :  { %2778 = vpow2.f32 %v1025_v33  ;;  %v1002_v49 = vmax.f32 %v1000_v47, %v1001_v40  ;;  %v996_v50 = vmax.f32 %v994_v27, %v995_v42 }
  0x98   :  { %v1012_v51 = vmax.f32 %v1010_v29, %v1011_v46  ;;  %v1006_v56 = vmax.f32 %v1004_v39, %v1005_v48 }
  0x99   :  { %v1020_v57 = vsub.f32 %v3287_v60, %v1002_v49  ;;  %v1019_v58 = vsub.f32 %v3290_v61, %v996_v50 }
  0x9a   :  { %v1013_v59 = vrot.slane %v1012_v51, 1  ;;  %v1007_v62 = vrot.slane %v1006_v56, 1 }
  0x9b   :  { %v1033_v63 = vmul.f32 1.442695, %v1020_v57  ;;  %v1031_v0 = vmul.f32 1.442695, %v1019_v58 }
  0x9c   :  { %v1014_v1 = vmax.f32 %v1012_v51, %v1013_v59  ;;  %v1008_v2 = vmax.f32 %v1006_v56, %v1007_v62 }
  0x9d   :  { %2780 = vpow2.f32 %v1033_v63 }
  0x9e   :  { %v1022_v3 = vsub.f32 %v3307_v16, %v1014_v1  ;;  %2782 = vpow2.f32 %v1031_v0  ;;  %v1021_v7 = vsub.f32 %v3310_v17, %v1008_v2 }
  0x9f   :  { %v3322_v8 = vpop.eup %2772 }
  0xa0   :  { %v1037_v9 = vmul.f32 1.442695, %v1022_v3  ;;  %v3324_v13 = vpop.eup %2774  ;;  %v1035_v14 = vmul.f32 1.442695, %v1021_v7  ;;  %v1051_v15 = vrot.slane %v3322_v8, 4 }
  0xa1   :  { %v1039_v19 = vrot.slane %v3324_v13, 4 }
  0xa2   :  { %2784 = vpow2.f32 %v1037_v9  ;;  %v1052_v20 = vadd.f32 %v3322_v8, %v1051_v15 }
  0xa3   :  { %2786 = vpow2.f32 %v1035_v14  ;;  %v3329_v25 = vpop.eup %2776  ;;  %v1040_v26 = vadd.f32 %v3324_v13, %v1039_v19 }
  0xa4   :  { %v3332_v28 = vpop.eup %2778  ;;  %v1053_v35 = vrot.slane %v1052_v20, 2  ;;  %v1057_v41 = vrot.slane %v3329_v25, 4 }
  0xa5   :  { %v1045_v43 = vrot.slane %v3332_v28, 4  ;;  %v1041_v44 = vrot.slane %v1040_v26, 2 }
  0xa6   :  { %v1054_v45 = vadd.f32 %v1053_v35, %v1052_v20  ;;  %v1058_v47 = vadd.f32 %v3329_v25, %v1057_v41 }
  0xa7   :  { %v1046_v27 = vadd.f32 %v3332_v28, %v1045_v43  ;;  %v1042_v29 = vadd.f32 %v1041_v44, %v1040_v26 }
  0xa8   :  { %v1055_v32 = vrot.slane %v1054_v45, 1  ;;  %v1059_v33 = vrot.slane %v1058_v47, 2 }
  0xa9   :  { %v1047_v39 = vrot.slane %v1046_v27, 2  ;;  %v1043_v40 = vrot.slane %v1042_v29, 1 }
  0xaa   :  { %v3338_v42 = vpop.eup %2780  ;;  %v1056_v46 = vadd.f32 %v1055_v32, %v1054_v45  ;;  %v1060_v48 = vadd.f32 %v1059_v33, %v1058_v47 }
  0xab   :  { %v2783_v49 = vpop.eup %2782  ;;  %v1048_v50 = vadd.f32 %v1047_v39, %v1046_v27  ;;  %v1044_v51 = vadd.f32 %v1043_v40, %v1042_v29  ;;  %v1069_v56 = vrot.slane %v3338_v42, 4 }
  0xac   :  { %v1061_v57 = vrot.slane %v1060_v48, 1  ;;  %v1063_v58 = vrot.slane %v2783_v49, 4 }
  0xad   :  { %v1049_v59 = vrot.slane %v1048_v50, 1  ;;  %2788 = vrcp.f32 %v1044_v51  ;;  %v1070_v62 = vadd.f32 %v3338_v42, %v1069_v56 }
  0xae   :  { %2790 = vrcp.f32 %v1056_v46  ;;  %v1062_v0 = vadd.f32 %v1061_v57, %v1060_v48  ;;  %v1064_v1 = vadd.f32 %v2783_v49, %v1063_v58 }
  0xaf   :  { %v2785_v63 = vpop.eup %2784  ;;  %v1050_v3 = vadd.f32 %v1049_v59, %v1048_v50  ;;  %v1071_v9 = vrot.slane %v1070_v62, 2 }
  0xb0   :  { %v2787_v2 = vpop.eup %2786  ;;  %v1081_v7 = vrot.slane %v2785_v63, 4  ;;  %2792 = vrcp.f32 %v1062_v0  ;;  %v1065_v15 = vrot.slane %v1064_v1, 2 }
  0xb1   :  { %v1075_v14 = vrot.slane %v2787_v2, 4  ;;  %2794 = vrcp.f32 %v1050_v3  ;;  %v1072_v20 = vadd.f32 %v1071_v9, %v1070_v62 }
  0xb2   :  { %v1082_v19 = vadd.f32 %v2785_v63, %v1081_v7  ;;  %v1066_v35 = vadd.f32 %v1065_v15, %v1064_v1 }
  0xb3   :  { %v1076_v26 = vadd.f32 %v2787_v2, %v1075_v14  ;;  %v1073_v43 = vrot.slane %v1072_v20, 1 }
  0xb4   :  { %v1083_v41 = vrot.slane %v1082_v19, 2  ;;  %v1067_v45 = vrot.slane %v1066_v35, 1 }
  0xb5   :  { %v1077_v44 = vrot.slane %v1076_v26, 2  ;;  %v1074_v27 = vadd.f32 %v1073_v43, %v1072_v20  ;;  %v3397_v43 = vld [vmem:[%s3766_s5 + $0x58] sm:$0xff] }
  0xb6   :  { %v1084_v47 = vadd.f32 %v1083_v41, %v1082_v19  ;;  %v1068_v32 = vadd.f32 %v1067_v45, %v1066_v35  ;;  %3850 = vst [vmem:[#allocation26_spill] sm:$0xff] %v3397_v43  ;;  %v3411_v45 = vld [vmem:[%s3766_s5 + $0x48] sm:$0xff] }
  0xb7   :  { %v1078_v29 = vadd.f32 %v1077_v44, %v1076_v26  ;;  %2796 = vrcp.f32 %v1074_v27  ;;  %v3404_v44 = vld [vmem:[%s3766_s5 + $0x50] sm:$0xff]  ;;  %3852 = vst [vmem:[#allocation28_spill] sm:$0xff] %v3411_v45  ;;  %v3425_v27 = vld [vmem:[%s3766_s5 + $0x38] sm:$0xff] }
  0xb8   :  { %v1085_v33 = vrot.slane %v1084_v47, 1  ;;  %2798 = vrcp.f32 %v1068_v32  ;;  %3851 = vst [vmem:[#allocation27_spill] sm:$0xff] %v3404_v44  ;;  %3854 = vst [vmem:[#allocation30_spill] sm:$0xff] %v3425_v27 }
  0xb9   :  { %v1079_v39 = vrot.slane %v1078_v29, 1 }
  0xba   :  { %v1086_v40 = vadd.f32 %v1085_v33, %v1084_v47  ;;  %v2789_v46 = vpop.eup %2788  ;;  %v3418_v47 = vld [vmem:[%s3766_s5 + $0x40] sm:$0xff]  ;;  %v3441_v33 = vld [vmem:[%s3766_s5 + $0x28] sm:$0xff] }
  0xbb   :  { %v1080_v48 = vadd.f32 %v1079_v39, %v1078_v29  ;;  %v2791_v50 = vpop.eup %2790  ;;  %v1103_v51 = vmul.f32 %v2789_v46, %v3324_v13  ;;  %3853 = vst [vmem:[#allocation29_spill] sm:$0xff] %v3418_v47  ;;  %v3432_v29 = vld [vmem:[%s3766_s5 + $0x30] sm:$0xff]  ;;  %3856 = vst [vmem:[#allocation32_spill] sm:$0xff] %v3441_v33  ;;  %v3448_v39 = vld [vmem:[%s3766_s5 + $0x20] sm:$0xff] }
  0xbc   :  { %2800 = vrcp.f32 %v1086_v40  ;;  %v1105_v59 = vmul.f32 %v2791_v50, %v3322_v8  ;;  %3855 = vst [vmem:[#allocation31_spill] sm:$0xff] %v3432_v29  ;;  %3857 = vst [vmem:[#allocation33_spill] sm:$0xff] %v3448_v39  ;;  %v3455_v46 = vld [vmem:[%s3766_s5 + $0x18] sm:$0xff]  ;;  %v3467_v50 = vld [vmem:[%s3766_s5 + $0x8] sm:$0xff] }
  0xbd   :  { %2802 = vrcp.f32 %v1080_v48  ;;  %v2793_v56 = vpop.eup %2792  ;;  %v1111_v57 = vmul.f32 %v1103_v51, %v3228_v11  ;;  %3858 = vst [vmem:[#allocation34_spill] sm:$0xff] %v3455_v46  ;;  %v3462_v48 = vld [vmem:[%s3766_s5 + $0x10] sm:$0xff]  ;;  %3860 = vst [vmem:[#allocation36_spill] sm:$0xff] %v3467_v50 }
  0xbe   :  { %v2795_v58 = vpop.eup %2794  ;;  %v1106_v1 = vmul.f32 %v2793_v56, %v3329_v25  ;;  %v1113_v3 = vmul.f32 %v1105_v59, %v3226_v10  ;;  %3859 = vst [vmem:[#allocation35_spill] sm:$0xff] %v3462_v48  ;;  %v3474_v56 = vld [vmem:[%s3766_s5] sm:$0xff] }
  0xbf   :  { %v1104_v62 = vmul.f32 %v2795_v58, %v3332_v28  ;;  %2632 = vmatprep.mubr.msk.f32.mxu0 %vm1119_vm10, %v1111_v57  ;;  %3861 = vst [vmem:[#allocation37_spill] sm:$0xff] %v3474_v56 }
  0xc0   :  { %v1114_v8 = vmul.f32 %v1106_v1, %v3244_v23 }
  0xc1   :  { %v1112_v0 = vmul.f32 %v1104_v62, %v3246_v24 }
  0xc3   :  { %2633 = vmatmul.mubr.msk.f32.vlgmr.msra.gmra.mxu0 %vm1119_vm10, %v1112_v0 }
  0xc4   :  { %v2797_v13 = vpop.eup %2796  ;;  %2635 = vmatprep.mubr.msk.f32.mxu0 %vm1119_vm10, %v1113_v3  ;;  %2689 = vmatpush3.msk.msra.mxu0 %vm1144_vm1, %v3217_v6 }
  0xc5   :  { %v2799_v7 = vpop.eup %2798  ;;  %v1108_v28 = vmul.f32 %v2797_v13, %v3338_v42  ;;  %v3368_v42 = vld [vmem:[%s3766_s5 + $0x78] sm:$0xff] }
  0xc6   :  { %v1107_v9 = vmul.f32 %v2799_v7, %v2783_v49  ;;  %3846 = vst [vmem:[#allocation22_spill] sm:$0xff] %v3368_v42  ;;  %2644 = vmatprep.subr.mxu1 %v3368_v42  ;;  %2702 = vmatprep.subr.mxu0 %v3368_v42  ;;  %v3376_v49 = vld [vmem:[%s3766_s5 + $0x70] sm:$0xff] }
  0xc7   :  { %2636 = vmatmul.mubr.msk.f32.gmra.mxu0 %vm1119_vm10, %v1114_v8  ;;  %v1116_v20 = vmul.f32 %v1108_v28, %v3266_v37  ;;  %2645 = vmatpush3.msra.mxu1 %v3368_v42  ;;  %3847 = vst [vmem:[#allocation23_spill] sm:$0xff] %v3376_v49 }
  0xc8   :  { %v1115_v25 = vmul.f32 %v1107_v9, %v3268_v38  ;;  %2646 = vmatprep.subr.mxu1 %v3376_v49 }
  0xc9   :  { %v2801_v14 = vpop.eup %2800  ;;  %2647 = vmatpush3.msra.mxu1 %v3376_v49 }
  0xca   :  { %v2803_v15 = vpop.eup %2802  ;;  %v1110_v19 = vmul.f32 %v2801_v14, %v2785_v63  ;;  %2638 = vmatprep.mubr.msk.f32.mxu0 %vm1119_vm10, %v1115_v25  ;;  %v3383_v63 = vld [vmem:[%s3766_s5 + $0x68] sm:$0xff] }
  0xcb   :  { %v1109_v26 = vmul.f32 %v2803_v15, %v2787_v2  ;;  %2639 = vmatmul.mubr.msk.f32.gmra.mxu0 %vm1119_vm10, %v1116_v20  ;;  %3848 = vst [vmem:[#allocation24_spill] sm:$0xff] %v3383_v63  ;;  %2648 = vmatprep.subr.mxu1 %v3383_v63  ;;  %v3390_v2 = vld [vmem:[%s3766_s5 + $0x60] sm:$0xff] }
  0xcc   :  { %v1118_v41 = vmul.f32 %v1110_v19, %v3282_v54  ;;  %2649 = vmatpush3.msra.mxu1 %v3383_v63  ;;  %3849 = vst [vmem:[#allocation25_spill] sm:$0xff] %v3390_v2 }
  0xcd   :  { %v1117_v35 = vmul.f32 %v1109_v26, %v3284_v55  ;;  %2650 = vmatprep.subr.mxu1 %v3390_v2 }
  0xce   :  { %2651 = vmatpush3.msra.mxu1 %v3390_v2 }
  0xcf   :  { %2641 = vmatprep.mubr.msk.f32.mxu0 %vm1119_vm10, %v1117_v35  ;;  %2652 = vmatprep.subr.mxu1 %v3397_v43 }
  0xd0   :  { %2642 = vmatmul.mubr.msk.f32.gmra.mxu0 %vm1119_vm10, %v1118_v41  ;;  %2653 = vmatpush3.msra.mxu1 %v3397_v43 }
  0xd1   :  { %2654 = vmatprep.subr.mxu1 %v3404_v44  ;;  %v3434_v32 = vpop.f32.mrf.mxu1 }
  0xd2   :  { %2655 = vmatpush3.msra.mxu1 %v3404_v44 }
  0xd3   :  { %2656 = vmatprep.subr.mxu1 %v3411_v45  ;;  %v208_v40 = vpop.f32.mrf.mxu1 }
  0xd4   :  { %2657 = vmatpush3.msra.mxu1 %v3411_v45  ;;  %v2335_v45 = vld [vmem:[%s3764_s3] ss:$0 sm:$0xff]  ;;  %s2939_s3 = smov [#allocation2]  }
  0xd5   :  { %2658 = vmatprep.subr.mxu1 %v3418_v47  ;;  %v2529_v51 = vpop.f32.mrf.mxu1  ;;  %v219_v10 = vadd.f32 %v3434_v32, %v2335_v45  ;;  %v209_v5 = vadd.f32 %v2335_v45, %v208_v40  ;;  %s2327_s16 = sshll.u32 %s2939_s3, 4  ;;  %s2328_s16 = int_to_ptr.vmem [resolvable:$true] %s2327_s16 }
  0xd6   :  { %2659 = vmatpush3.msra.mxu1 %v3418_v47  ;;  %v239_v61 = vadd.f32 %v2529_v51, %v2335_v45  ;;  %s2916_s17 = scalar_lea.vmem %s2328_s16, 128  ;;  %p2921_p1 = scmp.lt.s32.totalorder %s2328_s16, %s2328_s16 }
  0xd7   :  { %2660 = vmatprep.subr.mxu1 %v3425_v27  ;;  %v228_v57 = vpop.f32.mrf.mxu1  ;;  %p2917_p0 = scmp.ne.s32.totalorder %s2328_s16, %s2916_s17  ;;  %p2922_p2 = scmp.lt.s32.totalorder %s2916_s17, %s2916_s17 }
  0xd8   :  { %2661 = vmatpush3.msra.mxu1 %v3425_v27  ;;  %v229_v60 = vadd.f32 %v2335_v45, %v228_v57 }
  0xd9   :  { %2662 = vmatprep.subr.mxu1 %v3432_v29  ;;  %v2540_v58 = vpop.f32.mrf.mxu1  ;;  %p2923_p3 = por %p2922_p2, %p2921_p1 }
  0xda   :  { %2663 = vmatpush3.msra.mxu1 %v3432_v29  ;;  %v2520_v0 = vpop.f32.mrf.mxu0 }
  0xdb   :  { %2664 = vmatprep.subr.mxu1 %v3441_v33  ;;  %v329_v59 = vpop.f32.mrf.mxu1  ;;  %v179_v55 = vadd.f32 %v2520_v0, %v2335_v45  ;;  %p2924_p4 = pnand %p2923_p3, %p2917_p0 }
  0xdc   :  { %2665 = vmatpush3.msra.mxu1 %v3441_v33  ;;  %v168_v3 = vpop.f32.mrf.mxu0 }
  0xdd   :  { %2666 = vmatprep.subr.mxu1 %v3448_v39  ;;  %v2543_v62 = vpop.f32.mrf.mxu1  ;;  %v169_v44 = vadd.f32 %v2335_v45, %v168_v3  ;;  %v336_v2 = vadd.f32 %v2540_v58, %v179_v55 }
  0xde   :  { %2667 = vmatpush3.msra.mxu1 %v3448_v39  ;;  %v2523_v7 = vpop.f32.mrf.mxu0 }
  0xdf   :  { %2668 = vmatprep.subr.mxu1 %v3455_v46  ;;  %v341_v1 = vpop.f32.mrf.mxu1  ;;  %v199_v38 = vadd.f32 %v2523_v7, %v2335_v45  ;;  %v330_v49 = vadd.f32 %v329_v59, %v169_v44 }
  0xe0   :  { %2669 = vmatpush3.msra.mxu1 %v3455_v46  ;;  %v188_v28 = vpop.f32.mrf.mxu0 }
  0xe1   :  { %2670 = vmatprep.subr.mxu1 %v3462_v48  ;;  %v2546_v13 = vpop.f32.mrf.mxu1  ;;  %v189_v63 = vadd.f32 %v2335_v45, %v188_v28  ;;  %v348_v11 = vadd.f32 %v2543_v62, %v199_v38 }
  0xe2   :  { %2671 = vmatpush3.msra.mxu1 %v3462_v48  ;;  %v360_v0 = vadd.f32 %v2546_v13, %v219_v10 }
  0xe3   :  { %2672 = vmatprep.subr.mxu1 %v3467_v50  ;;  %v353_v8 = vpop.f32.mrf.mxu1  ;;  %v342_v4 = vadd.f32 %v341_v1, %v189_v63 }
  0xe4   :  { %2673 = vmatpush3.msra.mxu1 %v3467_v50  ;;  %v2560_v14 = vpop.f32.mrf.mxu0  ;;  %v354_v7 = vadd.f32 %v353_v8, %v209_v5 }
  0xe5   :  { %2674 = vmatprep.subr.mxu1 %v3474_v56  ;;  %v2549_v9 = vpop.f32.mrf.mxu1  ;;  %v459_v24 = vadd.f32 %v2560_v14, %v336_v2 }
  0xe6   :  { %2675 = vmatpush3.msra.mxu1 %v3474_v56  ;;  %v451_v15 = vpop.f32.mrf.mxu0  ;;  %v372_v28 = vadd.f32 %v2549_v9, %v239_v61 }
  0xe7   :  { %2746 = vmatprep.subr.msk.mxu1 %vm1144_vm1, %v3217_v6  ;;  %v365_v25 = vpop.f32.mrf.mxu1  ;;  %v452_v17 = vadd.f32 %v451_v15, %v330_v49 }
  0xe8   :  { %v2563_v20 = vpop.f32.mrf.mxu0  ;;  %v366_v38 = vadd.f32 %v365_v25, %v229_v60 }
  0xe9   :  { %v2580_v19 = vpop.f32.mrf.mxu1  ;;  %v473_v52 = vadd.f32 %v2563_v20, %v348_v11 }
  0xea   :  { %v465_v35 = vpop.f32.mrf.mxu0  ;;  %v586_v3 = vadd.f32 %v2580_v19, %v459_v24 }
  0xeb   :  { %v577_v26 = vpop.f32.mrf.mxu1  ;;  %v466_v58 = vadd.f32 %v465_v35, %v342_v4 }
  0xec   :  { %v2566_v56 = vpop.f32.mrf.mxu0  ;;  %v578_v55 = vadd.f32 %v577_v26, %v452_v17 }
  0xed   :  { %v2583_v41 = vpop.f32.mrf.mxu1  ;;  %v487_v32 = vadd.f32 %v2566_v56, %v360_v0 }
  0xee   :  { %v479_v48 = vpop.f32.mrf.mxu0  ;;  %v602_v12 = vadd.f32 %v2583_v41, %v473_v52 }
  0xef   :  { %v593_v50 = vpop.f32.mrf.mxu1  ;;  %v480_v49 = vadd.f32 %v479_v48, %v354_v7 }
  0xf0   :  { %v2569_v39 = vpop.f32.mrf.mxu0  ;;  %v594_v40 = vadd.f32 %v593_v50, %v466_v58 }
  0xf1   :  { %v2586_v46 = vpop.f32.mrf.mxu1  ;;  %v501_v10 = vadd.f32 %v2569_v39, %v372_v28 }
  0xf2   :  { %v493_v29 = vpop.f32.mrf.mxu0  ;;  %v618_v51 = vadd.f32 %v2586_v46, %v487_v32 }
  0xf3   :  { %v609_v33 = vpop.f32.mrf.mxu1  ;;  %v494_v5 = vadd.f32 %v493_v29, %v366_v38 }
  0xf4   :  { %v2600_v47 = vpop.f32.mrf.mxu0  ;;  %v610_v45 = vadd.f32 %v609_v33, %v480_v49 }
  0xf5   :  { %v2589_v27 = vpop.f32.mrf.mxu1  ;;  %v723_v2 = vadd.f32 %v2600_v47, %v586_v3 }
  0xf6   :  { %v716_v43 = vpop.f32.mrf.mxu0  ;;  %v634_v61 = vadd.f32 %v2589_v27, %v501_v10 }
  0xf7   :  { %v625_v54 = vpop.f32.mrf.mxu1  ;;  %v717_v63 = vadd.f32 %v716_v43, %v578_v55 }
  0xf8   :  { %v2603_v23 = vpop.f32.mrf.mxu0  ;;  %v626_v60 = vadd.f32 %v625_v54, %v494_v5 }
  0xf9   :  { %v2620_v37 = vpop.f32.mrf.mxu1  ;;  %v735_v11 = vadd.f32 %v2603_v23, %v602_v12 }
  0xfa   :  { %v728_v16 = vpop.f32.mrf.mxu0  ;;  %v840_v24 = vadd.f32 %v2620_v37, %v723_v2 }
  0xfb   :  { %v833_v42 = vpop.f32.mrf.mxu1  ;;  %v729_v4 = vadd.f32 %v728_v16, %v594_v40 }
  0xfc   :  { %v2606_v44 = vpop.f32.mrf.mxu0  ;;  %v834_v17 = vadd.f32 %v833_v42, %v717_v63  ;;  %v888_v52 = vmul.f32 0.01, %v840_v24  ;;  %vm880_vm11 = vcmp.ge.f32.partialorder %v840_v24, 0.0 }
  0xfd   :  { %v2623_v53 = vpop.f32.mrf.mxu1  ;;  %v747_v47 = vadd.f32 %v2606_v44, %v618_v51 }
  0xfe   :  { %v740_v62 = vpop.f32.mrf.mxu0  ;;  %v852_v56 = vadd.f32 %v2623_v53, %v735_v11  ;;  %v887_v48 = vmul.f32 0.01, %v834_v17  ;;  %vm879_vm12 = vcmp.ge.f32.partialorder %v834_v17, 0.0  ;;  %v3486_v37 = vsel %vm880_vm11, %v840_v24, %v888_v52 }
  0xff   :  { %v845_v59 = vpop.f32.mrf.mxu1  ;;  %v741_v50 = vadd.f32 %v740_v62, %v610_v45 }
 0x100   :  { %v2609_v57 = vpop.f32.mrf.mxu0  ;;  %v846_v43 = vadd.f32 %v845_v59, %v729_v4  ;;  %v890_v12 = vmul.f32 0.01, %v852_v56  ;;  %vm882_vm13 = vcmp.ge.f32.partialorder %v852_v56, 0.0  ;;  %v3489_v29 = vsel %vm879_vm12, %v834_v17, %v887_v48 }
 0x101   :  { %v2626_v1 = vpop.f32.mrf.mxu1  ;;  %v759_v42 = vadd.f32 %v2609_v57, %v634_v61 }
 0x102   :  { %v752_v8 = vpop.f32.mrf.mxu0  ;;  %v864_v23 = vadd.f32 %v2626_v1, %v747_v47  ;;  %v889_v53 = vmul.f32 0.01, %v846_v43  ;;  %vm881_vm14 = vcmp.ge.f32.partialorder %v846_v43, 0.0  ;;  %v3492_v15 = vsel %vm882_vm13, %v852_v56, %v890_v12 }
 0x103   :  { %v857_v13 = vpop.f32.mrf.mxu1  ;;  %v753_v54 = vadd.f32 %v752_v8, %v626_v60 }
 0x104   :  { %v858_v33 = vadd.f32 %v857_v13, %v741_v50  ;;  %v892_v19 = vmul.f32 0.01, %v864_v23  ;;  %vm884_vm15 = vcmp.ge.f32.partialorder %v864_v23, 0.0  ;;  %v3495_v3 = vsel %vm881_vm14, %v846_v43, %v889_v53 }
 0x105   :  { %v2629_v39 = vpop.f32.mrf.mxu1 }
 0x106   :  { %v876_v20 = vadd.f32 %v2629_v39, %v759_v42  ;;  %vm883_vm0 = vcmp.ge.f32.partialorder %v858_v33, 0.0  ;;  %v891_v7 = vmul.f32 0.01, %v858_v33  ;;  %v3498_v2 = vsel %vm884_vm15, %v864_v23, %v892_v19 }
 0x107   :  { %v869_v9 = vpop.f32.mrf.mxu1 }
 0x108   :  { %v870_v55 = vadd.f32 %v869_v9, %v753_v54  ;;  %vm886_vm2 = vcmp.ge.f32.partialorder %v876_v20, 0.0  ;;  %v894_v38 = vmul.f32 0.01, %v876_v20  ;;  %v3501_v51 = vsel %vm883_vm0, %v858_v33, %v891_v7 }
 0x10a   :  { %vm885_vm3 = vcmp.ge.f32.partialorder %v870_v55, 0.0  ;;  %v893_v10 = vmul.f32 0.01, %v870_v55  ;;  %v3505_v57 = vsel %vm886_vm2, %v876_v20, %v894_v38 }
 0x10c   :  { %v3509_v43 = vsel %vm885_vm3, %v870_v55, %v893_v10 }
 0x183   :  { %v2634_v16 = vpop.f32.mrf.mxu0 }
 0x184   :  { %v1254_v27 = vmul.f32 %v2634_v16, %v3486_v37 }
 0x185   :  { %v1214_v46 = vpop.f32.mrf.mxu0 }
 0x186   :  { %v1267_v14 = vrot.slane %v1254_v27, 4  ;;  %v1253_v25 = vmul.f32 %v1214_v46, %v3489_v29 }
 0x187   :  { %v2637_v26 = vpop.f32.mrf.mxu0 }
 0x188   :  { %v1268_v35 = vadd.f32 %v1267_v14, %v1254_v27  ;;  %v1261_v41 = vrot.slane %v1253_v25, 4  ;;  %v1256_v0 = vmul.f32 %v2637_v26, %v3492_v15 }
 0x189   :  { %v1224_v58 = vpop.f32.mrf.mxu0 }
 0x18a   :  { %v1269_v44 = vrot.slane %v1268_v35, 2  ;;  %v1262_v59 = vadd.f32 %v1261_v41, %v1253_v25  ;;  %v1279_v28 = vrot.slane %v1256_v0, 4  ;;  %v1255_v32 = vmul.f32 %v1224_v58, %v3495_v3 }
 0x18b   :  { %v2640_v40 = vpop.f32.mrf.mxu0 }
 0x18c   :  { %v1270_v49 = vadd.f32 %v1269_v44, %v1268_v35  ;;  %v1263_v63 = vrot.slane %v1262_v59, 2  ;;  %v1280_v62 = vadd.f32 %v1279_v28, %v1256_v0  ;;  %v1273_v1 = vrot.slane %v1255_v32, 4 }
 0x18d   :  { %v1258_v24 = vmul.f32 %v2640_v40, %v3498_v2  ;;  %v1234_v11 = vpop.f32.mrf.mxu0 }
 0x18e   :  { %v1271_v45 = vrot.slane %v1270_v49, 1  ;;  %v1264_v5 = vadd.f32 %v1263_v63, %v1262_v59  ;;  %v1281_v17 = vrot.slane %v1280_v62, 2  ;;  %v1274_v4 = vadd.f32 %v1273_v1, %v1255_v32 }
 0x18f   :  { %v1291_v13 = vrot.slane %v1258_v24, 4  ;;  %v1257_v61 = vmul.f32 %v1234_v11, %v3501_v51 }
 0x190   :  { %v2643_v52 = vpop.f32.mrf.mxu0  ;;  %v1272_v56 = vadd.f32 %v1271_v45, %v1270_v49  ;;  %v1265_v47 = vrot.slane %v1264_v5, 1  ;;  %v1282_v60 = vadd.f32 %v1281_v17, %v1280_v62  ;;  %v1275_v48 = vrot.slane %v1274_v4, 2 }
 0x191   :  { %v1292_v50 = vadd.f32 %v1291_v13, %v1258_v24  ;;  %v1285_v8 = vrot.slane %v1257_v61, 4  ;;  %v1260_v39 = vmul.f32 %v2643_v52, %v3505_v57 }
 0x192   :  { %v1244_v12 = vpop.f32.mrf.mxu0  ;;  %2804 = vtanh.f32 %v1272_v56  ;;  %v1266_v23 = vadd.f32 %v1265_v47, %v1264_v5  ;;  %v1283_v42 = vrot.slane %v1282_v60, 1  ;;  %v1276_v16 = vadd.f32 %v1275_v48, %v1274_v4 }
 0x193   :  { %v1293_v27 = vrot.slane %v1292_v50, 2  ;;  %v1286_v53 = vadd.f32 %v1285_v8, %v1257_v61  ;;  %v1303_v33 = vrot.slane %v1260_v39, 4  ;;  %v1259_v54 = vmul.f32 %v1244_v12, %v3509_v43 }
 0x194   :  { %2806 = vtanh.f32 %v1266_v23  ;;  %v1284_v46 = vadd.f32 %v1283_v42, %v1282_v60  ;;  %v1277_v9 = vrot.slane %v1276_v16, 1 }
 0x195   :  { %v1294_v14 = vadd.f32 %v1293_v27, %v1292_v50  ;;  %v1287_v25 = vrot.slane %v1286_v53, 2  ;;  %v1304_v19 = vadd.f32 %v1303_v33, %v1260_v39  ;;  %v1297_v20 = vrot.slane %v1259_v54, 4 }
 0x196   :  { %2808 = vtanh.f32 %v1284_v46  ;;  %v1278_v26 = vadd.f32 %v1277_v9, %v1276_v16 }
 0x197   :  { %v1295_v35 = vrot.slane %v1294_v14, 1  ;;  %v1288_v41 = vadd.f32 %v1287_v25, %v1286_v53  ;;  %v1305_v0 = vrot.slane %v1304_v19, 2  ;;  %v1298_v7 = vadd.f32 %v1297_v20, %v1259_v54  ;;  %v3862_v25 = vld [vmem:[#allocation7_spill] sm:$0xff] }
 0x198   :  { %2810 = vtanh.f32 %v1278_v26 }
 0x199   :  { %v1296_v55 = vadd.f32 %v1295_v35, %v1294_v14  ;;  %v1289_v58 = vrot.slane %v1288_v41, 1  ;;  %v1306_v44 = vadd.f32 %v1305_v0, %v1304_v19  ;;  %v1299_v59 = vrot.slane %v1298_v7, 2 }
 0x19b   :  { %v1290_v28 = vadd.f32 %v1289_v58, %v1288_v41  ;;  %v1307_v32 = vrot.slane %v1306_v44, 1  ;;  %v1300_v38 = vadd.f32 %v1299_v59, %v1298_v7  ;;  %2812 = vtanh.f32 %v1296_v55  ;;  %v3863_v41 = vld [vmem:[#allocation16_spill] sm:$0xff] }
 0x19d   :  { %2814 = vtanh.f32 %v1290_v28  ;;  %v1308_v40 = vadd.f32 %v1307_v32, %v1306_v44  ;;  %v1301_v49 = vrot.slane %v1300_v38, 1  ;;  %v3864_v28 = vld [vmem:[#allocation12_spill] sm:$0xff] }
 0x19f   :  { %v2805_v63 = vpop.eup %2804  ;;  %v1302_v62 = vadd.f32 %v1301_v49, %v1300_v38  ;;  %2816 = vtanh.f32 %v1308_v40  ;;  %v3865_v38 = vld [vmem:[#allocation17_spill] sm:$0xff] }
 0x1a0   :  { %v1318_v11 = vmul.f32 %v2805_v63, %v3486_v37 }
 0x1a1   :  { %v2807_v1 = vpop.eup %2806  ;;  %2818 = vtanh.f32 %v1302_v62 }
 0x1a2   :  { %v1317_v10 = vmul.f32 %v2807_v1, %v3489_v29 }
 0x1a3   :  { %v2809_v24 = vpop.eup %2808 }
 0x1a4   :  { %2676 = vmatprep.mubr.f32.mxu1 %v1317_v10  ;;  %v1320_v17 = vmul.f32 %v2809_v24, %v3492_v15 }
 0x1a5   :  { %v2811_v45 = vpop.eup %2810  ;;  %2677 = vmatmul.mubr.f32.vlgmr.msra.gmra.mxu1 %v1318_v11  ;;  %v3866_v11 = vld [vmem:[#allocation13_spill] sm:$0xff] }
 0x1a6   :  { %v1319_v5 = vmul.f32 %v2811_v45, %v3495_v3  ;;  %2747 = vmatpush3.msk.msra.mxu1 %vm1144_vm1, %v3217_v6  ;;  %vm2305_vm1 = vcmask 1041409  }
 0x1a8   :  { %2679 = vmatprep.mubr.f32.mxu1 %v1319_v5  ;;  %v2813_v4 = vpop.eup %2812  ;;  %v3867_v5 = vld [vmem:[#allocation20_spill] sm:$0xff] }
 0x1a9   :  { %2680 = vmatmul.mubr.f32.gmra.mxu1 %v1320_v17  ;;  %v1322_v52 = vmul.f32 %v2813_v4, %v3498_v2 }
 0x1aa   :  { %v2815_v13 = vpop.eup %2814 }
 0x1ab   :  { %v1321_v61 = vmul.f32 %v2815_v13, %v3501_v51 }
 0x1ac   :  { %v2817_v56 = vpop.eup %2816 }
 0x1ad   :  { %2682 = vmatprep.mubr.f32.mxu1 %v1321_v61  ;;  %v1324_v48 = vmul.f32 %v2817_v56, %v3505_v57 }
 0x1ae   :  { %v2819_v47 = vpop.eup %2818  ;;  %2683 = vmatmul.mubr.f32.gmra.mxu1 %v1322_v52 }
 0x1af   :  { %v1323_v60 = vmul.f32 %v2819_v47, %v3509_v43 }
 0x1b1   :  { %2685 = vmatprep.mubr.f32.mxu1 %v1323_v60 }
 0x1b2   :  { %2686 = vmatmul.mubr.f32.gmra.mxu1 %v1324_v48  ;;  %v3868_v48 = vld [vmem:[#allocation18_spill] sm:$0xff] }
 0x265   :  { %v2678_v6 = vpop.f32.mrf.mxu1 }
 0x266   :  { %v1431_v50 = vadd.f32 %v2678_v6, %v3264_v36 }
 0x267   :  { %v1391_v8 = vpop.f32.mrf.mxu1 }
 0x268   :  { %v3525_v39 = vmul.f32 %v1431_v50, %v3256_v31  ;;  %v1430_v12 = vadd.f32 %v1391_v8, %v3242_v22  ;;  %v3869_v50 = vld [vmem:[#allocation21_spill] sm:$0xff] }
 0x269   :  { %v2681_v23 = vpop.f32.mrf.mxu1 }
 0x26a   :  { %v1453_v42 = vsel %vm1119_vm10, %v3525_v39, -inf  ;;  %v3531_v16 = vmul.f32 %v1430_v12, %v3236_v18  ;;  %v1433_v27 = vadd.f32 %v2681_v23, %v3261_v34 }
 0x26b   :  { %v1454_v53 = vrot.slane %v1453_v42, 4  ;;  %v1401_v33 = vpop.f32.mrf.mxu1 }
 0x26c   :  { %v1446_v36 = vsel %vm1119_vm10, %v3531_v16, -inf  ;;  %v3537_v54 = vmul.f32 %v1433_v27, %v3253_v30  ;;  %v1432_v46 = vadd.f32 %v1401_v33, %v3239_v21 }
 0x26d   :  { %v1455_v22 = vmax.f32 %v1453_v42, %v1454_v53  ;;  %v1447_v9 = vrot.slane %v1446_v36, 4 }
 0x26e   :  { %v1467_v14 = vsel %vm1119_vm10, %v3537_v54, -inf  ;;  %v3543_v19 = vmul.f32 %v1432_v46, %v3862_v25  ;;  %v2684_v20 = vpop.f32.mrf.mxu1  ;;  %v3870_v46 = vld [vmem:[#allocation19_spill] sm:$0xff] }
 0x26f   :  { %v1456_v34 = vrot.slane %v1455_v22, 2  ;;  %v1448_v26 = vmax.f32 %v1446_v36, %v1447_v9  ;;  %v1468_v35 = vrot.slane %v1467_v14, 4  ;;  %v1435_v0 = vadd.f32 %v2684_v20, %v3863_v41 }
 0x270   :  { %v1460_v7 = vsel %vm1119_vm10, %v3543_v19, -inf  ;;  %v1411_v55 = vpop.f32.mrf.mxu1 }
 0x271   :  { %v1457_v58 = vmax.f32 %v1455_v22, %v1456_v34  ;;  %v1449_v21 = vrot.slane %v1448_v26, 2  ;;  %v1469_v44 = vmax.f32 %v1467_v14, %v1468_v35  ;;  %v1461_v59 = vrot.slane %v1460_v7, 4 }
 0x272   :  { %v3549_v32 = vmul.f32 %v1435_v0, %v3864_v28  ;;  %v1434_v40 = vadd.f32 %v1411_v55, %v3865_v38  ;;  %v2687_v49 = vpop.f32.mrf.mxu1 }
 0x273   :  { %v1458_v63 = vrot.slane %v1457_v58, 1  ;;  %v1450_v62 = vmax.f32 %v1448_v26, %v1449_v21  ;;  %v1470_v1 = vrot.slane %v1469_v44, 2  ;;  %v1462_v10 = vmax.f32 %v1460_v7, %v1461_v59 }
 0x274   :  { %v1481_v24 = vsel %vm1119_vm10, %v3549_v32, -inf  ;;  %v3555_v45 = vmul.f32 %v1434_v40, %v3866_v11  ;;  %v1437_v17 = vadd.f32 %v2687_v49, %v3867_v5  ;;  %v1421_v4 = vpop.f32.mrf.mxu1 }
 0x275   :  { %v1459_v13 = vmax.f32 %v1457_v58, %v1458_v63  ;;  %v1451_v61 = vrot.slane %v1450_v62, 1  ;;  %v1471_v52 = vmax.f32 %v1469_v44, %v1470_v1  ;;  %v1463_v56 = vrot.slane %v1462_v10, 2 }
 0x276   :  { %v1482_v47 = vrot.slane %v1481_v24, 4  ;;  %v1474_v60 = vsel %vm1119_vm10, %v3555_v45, -inf  ;;  %v3561_v6 = vmul.f32 %v1437_v17, %v3868_v48  ;;  %v1436_v8 = vadd.f32 %v1421_v4, %v3869_v50 }
 0x277   :  { %v1503_v12 = vsub.f32 %v3525_v39, %v1459_v13  ;;  %v1452_v23 = vmax.f32 %v1450_v62, %v1451_v61  ;;  %v1472_v42 = vrot.slane %v1471_v52, 1  ;;  %v1464_v27 = vmax.f32 %v1462_v10, %v1463_v56 }
 0x278   :  { %v1483_v53 = vmax.f32 %v1481_v24, %v1482_v47  ;;  %v1475_v33 = vrot.slane %v1474_v60, 4  ;;  %v1495_v36 = vsel %vm1119_vm10, %v3561_v6, -inf  ;;  %v3568_v22 = vmul.f32 %v1436_v8, %v3870_v46 }
 0x279   :  { %v1512_v9 = vmul.f32 1.442695, %v1503_v12  ;;  %v1502_v14 = vsub.f32 %v3531_v16, %v1452_v23  ;;  %v1473_v20 = vmax.f32 %v1471_v52, %v1472_v42  ;;  %v1465_v34 = vrot.slane %v1464_v27, 1 }
 0x27a   :  { %v1484_v26 = vrot.slane %v1483_v53, 2  ;;  %v1476_v35 = vmax.f32 %v1474_v60, %v1475_v33  ;;  %v1496_v41 = vrot.slane %v1495_v36, 4  ;;  %v1488_v0 = vsel %vm1119_vm10, %v3568_v22, -inf }
 0x27b   :  { %2820 = vpow2.f32 %v1512_v9  ;;  %v1510_v7 = vmul.f32 1.442695, %v1502_v14  ;;  %v1505_v55 = vsub.f32 %v3537_v54, %v1473_v20  ;;  %v1466_v58 = vmax.f32 %v1464_v27, %v1465_v34 }
 0x27c   :  { %v1485_v21 = vmax.f32 %v1483_v53, %v1484_v26  ;;  %v1477_v44 = vrot.slane %v1476_v35, 2  ;;  %v1497_v59 = vmax.f32 %v1495_v36, %v1496_v41  ;;  %v1489_v38 = vrot.slane %v1488_v0, 4 }
 0x27d   :  { %2822 = vpow2.f32 %v1510_v7  ;;  %v1516_v40 = vmul.f32 1.442695, %v1505_v55  ;;  %v1504_v49 = vsub.f32 %v3543_v19, %v1466_v58 }
 0x27e   :  { %v1486_v63 = vrot.slane %v1485_v21, 1  ;;  %v1478_v62 = vmax.f32 %v1476_v35, %v1477_v44  ;;  %v1498_v1 = vrot.slane %v1497_v59, 2  ;;  %v1490_v10 = vmax.f32 %v1488_v0, %v1489_v38 }
 0x27f   :  { %2824 = vpow2.f32 %v1516_v40  ;;  %v1514_v24 = vmul.f32 1.442695, %v1504_v49 }
 0x280   :  { %v1487_v5 = vmax.f32 %v1485_v21, %v1486_v63  ;;  %v1479_v17 = vrot.slane %v1478_v62, 1  ;;  %v1499_v4 = vmax.f32 %v1497_v59, %v1498_v1  ;;  %v1491_v13 = vrot.slane %v1490_v10, 2 }
 0x281   :  { %2826 = vpow2.f32 %v1514_v24 }
 0x282   :  { %v1507_v61 = vsub.f32 %v3549_v32, %v1487_v5  ;;  %v1480_v52 = vmax.f32 %v1478_v62, %v1479_v17  ;;  %v1500_v56 = vrot.slane %v1499_v4, 1  ;;  %v1492_v47 = vmax.f32 %v1490_v10, %v1491_v13 }
 0x284   :  { %v1520_v60 = vmul.f32 1.442695, %v1507_v61  ;;  %v1506_v50 = vsub.f32 %v3555_v45, %v1480_v52  ;;  %v1501_v8 = vmax.f32 %v1499_v4, %v1500_v56  ;;  %v1493_v12 = vrot.slane %v1492_v47, 1 }
 0x286   :  { %2828 = vpow2.f32 %v1520_v60  ;;  %v1518_v23 = vmul.f32 1.442695, %v1506_v50  ;;  %v1509_v42 = vsub.f32 %v3561_v6, %v1501_v8  ;;  %v1494_v27 = vmax.f32 %v1492_v47, %v1493_v12 }
 0x288   :  { %v3578_v53 = vpop.eup %2820  ;;  %2830 = vpow2.f32 %v1518_v23  ;;  %v1524_v33 = vmul.f32 1.442695, %v1509_v42  ;;  %v1508_v36 = vsub.f32 %v3568_v22, %v1494_v27 }
 0x289   :  { %v1533_v9 = vsel %vm1119_vm10, %v3578_v53, 0.0 }
 0x28a   :  { %v3583_v14 = vpop.eup %2822  ;;  %v1534_v20 = vrot.slane %v1533_v9, 4  ;;  %2832 = vpow2.f32 %v1524_v33  ;;  %v1522_v34 = vmul.f32 1.442695, %v1508_v36 }
 0x28b   :  { %v1526_v26 = vsel %vm1119_vm10, %v3583_v14, 0.0 }
 0x28c   :  { %v3587_v35 = vpop.eup %2824  ;;  %v1535_v41 = vadd.f32 %v1534_v20, %v1533_v9  ;;  %v1527_v0 = vrot.slane %v1526_v26, 4  ;;  %2834 = vpow2.f32 %v1522_v34 }
 0x28d   :  { %v1547_v7 = vsel %vm1119_vm10, %v3587_v35, 0.0 }
 0x28e   :  { %v3591_v55 = vpop.eup %2826  ;;  %v1536_v58 = vrot.slane %v1535_v41, 2  ;;  %v1528_v21 = vadd.f32 %v1527_v0, %v1526_v26  ;;  %v1548_v44 = vrot.slane %v1547_v7, 4 }
 0x28f   :  { %v1540_v59 = vsel %vm1119_vm10, %v3591_v55, 0.0 }
 0x290   :  { %v1537_v38 = vadd.f32 %v1536_v58, %v1535_v41  ;;  %v1529_v40 = vrot.slane %v1528_v21, 2  ;;  %v1549_v49 = vadd.f32 %v1548_v44, %v1547_v7  ;;  %v1541_v63 = vrot.slane %v1540_v59, 4 }
 0x292   :  { %v1538_v62 = vrot.slane %v1537_v38, 1  ;;  %v1530_v1 = vadd.f32 %v1529_v40, %v1528_v21  ;;  %v1550_v10 = vrot.slane %v1549_v49, 2  ;;  %v1542_v24 = vadd.f32 %v1541_v63, %v1540_v59 }
 0x293   :  { %v3595_v5 = vpop.eup %2828 }
 0x294   :  { %v1539_v17 = vadd.f32 %v1538_v62, %v1537_v38  ;;  %v1551_v4 = vadd.f32 %v1550_v10, %v1549_v49  ;;  %v1543_v13 = vrot.slane %v1542_v24, 2  ;;  %v1561_v61 = vsel %vm1119_vm10, %v3595_v5, 0.0 }
 0x295   :  { %v3599_v52 = vpop.eup %2830  ;;  %v1562_v56 = vrot.slane %v1561_v61, 4  ;;  %v1531_v47 = vrot.slane %v1530_v1, 1 }
 0x296   :  { %2836 = vrcp.f32 %v1539_v17  ;;  %v1544_v60 = vadd.f32 %v1543_v13, %v1542_v24  ;;  %v1554_v50 = vsel %vm1119_vm10, %v3599_v52, 0.0  ;;  %v1552_v8 = vrot.slane %v1551_v4, 1 }
 0x297   :  { %v3603_v12 = vpop.eup %2832  ;;  %v1563_v23 = vadd.f32 %v1562_v56, %v1561_v61  ;;  %v1555_v42 = vrot.slane %v1554_v50, 4  ;;  %v1532_v27 = vadd.f32 %v1531_v47, %v1530_v1 }
 0x298   :  { %v1575_v33 = vsel %vm1119_vm10, %v3603_v12, 0.0  ;;  %v1545_v36 = vrot.slane %v1544_v60, 1  ;;  %v1553_v9 = vadd.f32 %v1552_v8, %v1551_v4 }
 0x299   :  { %v3607_v20 = vpop.eup %2834  ;;  %v1564_v34 = vrot.slane %v1563_v23, 2  ;;  %v1556_v26 = vadd.f32 %v1555_v42, %v1554_v50  ;;  %v1576_v41 = vrot.slane %v1575_v33, 4  ;;  %2838 = vrcp.f32 %v1532_v27 }
 0x29a   :  { %v1568_v0 = vsel %vm1119_vm10, %v3607_v20, 0.0  ;;  %v1546_v7 = vadd.f32 %v1545_v36, %v1544_v60  ;;  %2840 = vrcp.f32 %v1553_v9  ;;  %v3872_v9 = vld [vmem:[#allocation9_spill] sm:$0xff] }
 0x29b   :  { %v1565_v58 = vadd.f32 %v1564_v34, %v1563_v23  ;;  %v1557_v21 = vrot.slane %v1556_v26, 2  ;;  %v1577_v44 = vadd.f32 %v1576_v41, %v1575_v33  ;;  %v1569_v59 = vrot.slane %v1568_v0, 4  ;;  %v3871_v33 = vld [vmem:[#allocation6_spill] sm:$0xff] }
 0x29c   :  { %2842 = vrcp.f32 %v1546_v7 }
 0x29d   :  { %v1558_v38 = vadd.f32 %v1557_v21, %v1556_v26  ;;  %v1578_v40 = vrot.slane %v1577_v44, 2  ;;  %v1570_v49 = vadd.f32 %v1569_v59, %v1568_v0  ;;  %v1566_v63 = vrot.slane %v1565_v58, 1  ;;  %v3873_v0 = vld [vmem:[#allocation5_spill] sm:$0xff]  ;;  %v3877_v59 = vld [vmem:[#allocation24_spill] sm:$0xff] }
 0x29f   :  { %v1579_v62 = vadd.f32 %v1578_v40, %v1577_v44  ;;  %v1571_v1 = vrot.slane %v1570_v49, 2  ;;  %v1559_v10 = vrot.slane %v1558_v38, 1  ;;  %v1567_v24 = vadd.f32 %v1566_v63, %v1565_v58  ;;  %v3876_v44 = vld [vmem:[#allocation23_spill] sm:$0xff] }
 0x2a0   :  { %v3879_v63 = vld [vmem:[#allocation11_spill] sm:$0xff] }
 0x2a1   :  { %v1572_v17 = vadd.f32 %v1571_v1, %v1570_v49  ;;  %v1560_v4 = vadd.f32 %v1559_v10, %v1558_v38  ;;  %2844 = vrcp.f32 %v1567_v24  ;;  %v1580_v13 = vrot.slane %v1579_v62, 1  ;;  %v3878_v49 = vld [vmem:[#allocation25_spill] sm:$0xff]  ;;  %v3880_v10 = vld [vmem:[#allocation10_spill] sm:$0xff] }
 0x2a3   :  { %v2837_v61 = vpop.eup %2836  ;;  %2846 = vrcp.f32 %v1560_v4  ;;  %v1573_v56 = vrot.slane %v1572_v17, 1  ;;  %v1581_v47 = vadd.f32 %v1580_v13, %v1579_v62  ;;  %v3881_v4 = vld [vmem:[#allocation26_spill] sm:$0xff]  ;;  %v3883_v13 = vld [vmem:[#allocation15_spill] sm:$0xff] }
 0x2a4   :  { %v1599_v8 = vmul.f32 %v2837_v61, %v3578_v53  ;;  %v3874_v53 = vld [vmem:[#allocation22_spill] sm:$0xff] }
 0x2a5   :  { %v1574_v60 = vadd.f32 %v1573_v56, %v1572_v17  ;;  %2848 = vrcp.f32 %v1581_v47  ;;  %v3884_v56 = vld [vmem:[#allocation14_spill] sm:$0xff] }
 0x2a6   :  { %v2839_v50 = vpop.eup %2838  ;;  %v1607_v34 = vmul.f32 %v1599_v8, %v3872_v9  ;;  %v3889_v8 = vld [vmem:[#allocation32_spill] sm:$0xff] }
 0x2a7   :  { %v2841_v23 = vpop.eup %2840  ;;  %v1598_v42 = vmul.f32 %v2839_v50, %v3583_v14  ;;  %2850 = vrcp.f32 %v1574_v60  ;;  %v3875_v14 = vld [vmem:[#allocation8_spill] sm:$0xff]  ;;  %v3888_v50 = vld [vmem:[#allocation31_spill] sm:$0xff] }
 0x2a8   :  { %v1601_v41 = vmul.f32 %v2841_v23, %v3587_v35  ;;  %v3885_v60 = vld [vmem:[#allocation28_spill] sm:$0xff]  ;;  %v3890_v23 = vld [vmem:[#allocation33_spill] sm:$0xff] }
 0x2a9   :  { %v2843_v27 = vpop.eup %2842  ;;  %v1606_v36 = vmul.f32 %v1598_v42, %v3871_v33  ;;  %v3891_v42 = vld [vmem:[#allocation34_spill] sm:$0xff] }
 0x2aa   :  { %v1600_v26 = vmul.f32 %v2843_v27, %v3591_v55  ;;  %v1609_v21 = vmul.f32 %v1601_v41, %v3875_v14  ;;  %v3892_v27 = vld [vmem:[#allocation35_spill] sm:$0xff] }
 0x2ab   :  { %2690 = vmatprep.mubr.msk.f32.mxu0 %vm1119_vm10, %v1606_v36  ;;  %v3893_v36 = vld [vmem:[#allocation36_spill] sm:$0xff] }
 0x2ac   :  { %2691 = vmatmul.mubr.msk.f32.vlgmr.msra.gmra.mxu0 %vm1119_vm10, %v1607_v34  ;;  %v1608_v7 = vmul.f32 %v1600_v26, %v3873_v0  ;;  %v3894_v34 = vld [vmem:[#allocation37_spill] sm:$0xff] }
 0x2ad   :  { %2703 = vmatpush3.msra.mxu0 %v3874_v53 }
 0x2ae   :  { %v2845_v58 = vpop.eup %2844  ;;  %2693 = vmatprep.mubr.msk.f32.mxu0 %vm1119_vm10, %v1608_v7  ;;  %2704 = vmatprep.subr.mxu0 %v3876_v44 }
 0x2af   :  { %2705 = vmatpush3.msra.mxu0 %v3876_v44  ;;  %v1603_v35 = vmul.f32 %v2845_v58, %v3595_v5 }
 0x2b0   :  { %v2847_v55 = vpop.eup %2846  ;;  %2694 = vmatmul.mubr.msk.f32.gmra.mxu0 %vm1119_vm10, %v1609_v21  ;;  %2706 = vmatprep.subr.mxu0 %v3877_v59 }
 0x2b1   :  { %v1602_v38 = vmul.f32 %v2847_v55, %v3599_v52  ;;  %2707 = vmatpush3.msra.mxu0 %v3877_v59  ;;  %v1611_v24 = vmul.f32 %v1603_v35, %v3880_v10  ;;  %v3882_v52 = vld [vmem:[#allocation27_spill] sm:$0xff] }
 0x2b2   :  { %v2849_v40 = vpop.eup %2848  ;;  %2708 = vmatprep.subr.mxu0 %v3878_v49 }
 0x2b3   :  { %v1610_v62 = vmul.f32 %v1602_v38, %v3879_v63  ;;  %2709 = vmatpush3.msra.mxu0 %v3878_v49  ;;  %v1605_v17 = vmul.f32 %v2849_v40, %v3603_v12  ;;  %v3886_v12 = vld [vmem:[#allocation29_spill] sm:$0xff] }
 0x2b4   :  { %v2851_v1 = vpop.eup %2850  ;;  %2710 = vmatprep.subr.mxu0 %v3881_v4 }
 0x2b5   :  { %2696 = vmatprep.mubr.msk.f32.mxu0 %vm1119_vm10, %v1610_v62  ;;  %v1604_v5 = vmul.f32 %v2851_v1, %v3607_v20  ;;  %2711 = vmatpush3.msra.mxu0 %v3881_v4  ;;  %v1613_v47 = vmul.f32 %v1605_v17, %v3884_v56  ;;  %v3887_v20 = vld [vmem:[#allocation30_spill] sm:$0xff] }
 0x2b6   :  { %2697 = vmatmul.mubr.msk.f32.gmra.mxu0 %vm1119_vm10, %v1611_v24  ;;  %2712 = vmatprep.subr.mxu0 %v3882_v52 }
 0x2b7   :  { %v1612_v61 = vmul.f32 %v1604_v5, %v3883_v13  ;;  %2713 = vmatpush3.msra.mxu0 %v3882_v52 }
 0x2b8   :  { %2714 = vmatprep.subr.mxu0 %v3885_v60 }
 0x2b9   :  { %2699 = vmatprep.mubr.msk.f32.mxu0 %vm1119_vm10, %v1612_v61  ;;  %2715 = vmatpush3.msra.mxu0 %v3885_v60 }
 0x2ba   :  { %2700 = vmatmul.mubr.msk.f32.gmra.mxu0 %vm1119_vm10, %v1613_v47  ;;  %2716 = vmatprep.subr.mxu0 %v3886_v12 }
 0x2bb   :  { %2717 = vmatpush3.msra.mxu0 %v3886_v12 }
 0x2bc   :  { %2718 = vmatprep.subr.mxu0 %v3887_v20 }
 0x2bd   :  { %2719 = vmatpush3.msra.mxu0 %v3887_v20 }
 0x2be   :  { %2720 = vmatprep.subr.mxu0 %v3888_v50 }
 0x2bf   :  { %2721 = vmatpush3.msra.mxu0 %v3888_v50 }
 0x2c0   :  { %2722 = vmatprep.subr.mxu0 %v3889_v8 }
 0x2c1   :  { %2723 = vmatpush3.msra.mxu0 %v3889_v8 }
 0x2c2   :  { %2724 = vmatprep.subr.mxu0 %v3890_v23 }
 0x2c3   :  { %2725 = vmatpush3.msra.mxu0 %v3890_v23 }
 0x2c4   :  { %2726 = vmatprep.subr.mxu0 %v3891_v42 }
 0x2c5   :  { %2727 = vmatpush3.msra.mxu0 %v3891_v42 }
 0x2c6   :  { %2728 = vmatprep.subr.mxu0 %v3892_v27 }
 0x2c7   :  { %2729 = vmatpush3.msra.mxu0 %v3892_v27 }
 0x2c8   :  { %2730 = vmatprep.subr.mxu0 %v3893_v36 }
 0x2c9   :  { %2731 = vmatpush3.msra.mxu0 %v3893_v36 }
 0x2ca   :  { %2732 = vmatprep.subr.mxu0 %v3894_v34 }
 0x2cb   :  { %2733 = vmatpush3.msra.mxu0 %v3894_v34 }
 0x36c   :  { %v2692_v26 = vpop.f32.mrf.mxu0 }
 0x36d   :  { %v1744_v41 = vmul.f32 %v2692_v26, %v3486_v37 }
 0x36e   :  { %v1704_v7 = vpop.f32.mrf.mxu0 }
 0x36f   :  { %v1757_v53 = vrot.slane %v1744_v41, 4  ;;  %v1743_v58 = vmul.f32 %v1704_v7, %v3489_v29 }
 0x370   :  { %v2695_v21 = vpop.f32.mrf.mxu0 }
 0x371   :  { %v1758_v44 = vadd.f32 %v1757_v53, %v1744_v41  ;;  %v1751_v55 = vrot.slane %v1743_v58, 4  ;;  %v1746_v35 = vmul.f32 %v2695_v21, %v3492_v15 }
 0x372   :  { %v1714_v59 = vpop.f32.mrf.mxu0 }
 0x373   :  { %v1759_v38 = vrot.slane %v1758_v44, 2  ;;  %v1752_v40 = vadd.f32 %v1751_v55, %v1743_v58  ;;  %v1769_v49 = vrot.slane %v1746_v35, 4  ;;  %v1745_v62 = vmul.f32 %v1714_v59, %v3495_v3 }
 0x375   :  { %v1760_v1 = vadd.f32 %v1759_v38, %v1758_v44  ;;  %v1753_v24 = vrot.slane %v1752_v40, 2  ;;  %v1770_v17 = vadd.f32 %v1769_v49, %v1746_v35  ;;  %v1763_v4 = vrot.slane %v1745_v62, 4 }
 0x376   :  { %v2698_v5 = vpop.f32.mrf.mxu0 }
 0x377   :  { %v1761_v52 = vrot.slane %v1760_v1, 1  ;;  %v1754_v61 = vadd.f32 %v1753_v24, %v1752_v40  ;;  %v1771_v47 = vrot.slane %v1770_v17, 2  ;;  %v1764_v60 = vadd.f32 %v1763_v4, %v1745_v62 }
 0x378   :  { %v1748_v12 = vmul.f32 %v2698_v5, %v3498_v2  ;;  %v1724_v20 = vpop.f32.mrf.mxu0 }
 0x379   :  { %v1762_v50 = vadd.f32 %v1761_v52, %v1760_v1  ;;  %v1755_v8 = vrot.slane %v1754_v61, 1  ;;  %v1772_v23 = vadd.f32 %v1771_v47, %v1770_v17  ;;  %v1765_v42 = vrot.slane %v1764_v60, 2 }
 0x37a   :  { %v1781_v27 = vrot.slane %v1748_v12, 4  ;;  %v1747_v36 = vmul.f32 %v1724_v20, %v3501_v51  ;;  %v2701_v34 = vpop.f32.mrf.mxu0 }
 0x37b   :  { %v1756_v26 = vadd.f32 %v1755_v8, %v1754_v61  ;;  %v1773_v41 = vrot.slane %v1772_v23, 1  ;;  %v1766_v7 = vadd.f32 %v1765_v42, %v1764_v60  ;;  %2852 = vtanh.f32 %v1762_v50 }
 0x37c   :  { %v1782_v53 = vadd.f32 %v1781_v27, %v1748_v12  ;;  %v1775_v58 = vrot.slane %v1747_v36, 4  ;;  %v1750_v21 = vmul.f32 %v2701_v34, %v3505_v57  ;;  %v1734_v44 = vpop.f32.mrf.mxu0 }
 0x37d   :  { %2854 = vtanh.f32 %v1756_v26  ;;  %v1774_v55 = vadd.f32 %v1773_v41, %v1772_v23  ;;  %v1767_v35 = vrot.slane %v1766_v7, 1  ;;  %v1749_v59 = vmul.f32 %v1734_v44, %v3509_v43 }
 0x37e   :  { %v1783_v38 = vrot.slane %v1782_v53, 2  ;;  %v1776_v40 = vadd.f32 %v1775_v58, %v1747_v36  ;;  %v1793_v49 = vrot.slane %v1750_v21, 4 }
 0x37f   :  { %v1768_v62 = vadd.f32 %v1767_v35, %v1766_v7  ;;  %v1787_v1 = vrot.slane %v1749_v59, 4  ;;  %2856 = vtanh.f32 %v1774_v55 }
 0x380   :  { %v1784_v24 = vadd.f32 %v1783_v38, %v1782_v53  ;;  %v1777_v17 = vrot.slane %v1776_v40, 2  ;;  %v1794_v4 = vadd.f32 %v1793_v49, %v1750_v21 }
 0x381   :  { %2858 = vtanh.f32 %v1768_v62  ;;  %v1788_v5 = vadd.f32 %v1787_v1, %v1749_v59 }
 0x382   :  { %v1785_v52 = vrot.slane %v1784_v24, 1  ;;  %v1778_v61 = vadd.f32 %v1777_v17, %v1776_v40  ;;  %v1795_v47 = vrot.slane %v1794_v4, 2 }
 0x383   :  { %v1789_v60 = vrot.slane %v1788_v5, 2 }
 0x384   :  { %v1786_v12 = vadd.f32 %v1785_v52, %v1784_v24  ;;  %v1779_v20 = vrot.slane %v1778_v61, 1  ;;  %v1796_v50 = vadd.f32 %v1795_v47, %v1794_v4 }
 0x385   :  { %v1790_v8 = vadd.f32 %v1789_v60, %v1788_v5 }
 0x386   :  { %v1780_v23 = vadd.f32 %v1779_v20, %v1778_v61  ;;  %v1797_v42 = vrot.slane %v1796_v50, 1  ;;  %2860 = vtanh.f32 %v1786_v12 }
 0x387   :  { %v1791_v27 = vrot.slane %v1790_v8, 1 }
 0x388   :  { %2862 = vtanh.f32 %v1780_v23  ;;  %v1798_v36 = vadd.f32 %v1797_v42, %v1796_v50  ;;  %v2853_v34 = vpop.eup %2852 }
 0x389   :  { %v1792_v26 = vadd.f32 %v1791_v27, %v1790_v8  ;;  %v1808_v53 = vmul.f32 %v2853_v34, %v3486_v37 }
 0x38a   :  { %v2855_v41 = vpop.eup %2854  ;;  %2864 = vtanh.f32 %v1798_v36 }
 0x38b   :  { %2866 = vtanh.f32 %v1792_v26  ;;  %v1807_v7 = vmul.f32 %v2855_v41, %v3489_v29 }
 0x38c   :  { %v2857_v58 = vpop.eup %2856 }
 0x38d   :  { %2734 = vmatprep.mubr.f32.mxu0 %v1807_v7  ;;  %v1810_v55 = vmul.f32 %v2857_v58, %v3492_v15 }
 0x38e   :  { %v2859_v21 = vpop.eup %2858  ;;  %2735 = vmatmul.mubr.f32.vlgmr.msra.gmra.mxu0 %v1808_v53 }
 0x38f   :  { %v1809_v44 = vmul.f32 %v2859_v21, %v3495_v3 }
 0x391   :  { %2737 = vmatprep.mubr.f32.mxu0 %v1809_v44 }
 0x392   :  { %2738 = vmatmul.mubr.f32.gmra.mxu0 %v1810_v55 }
 0x393   :  { %v2861_v35 = vpop.eup %2860 }
 0x394   :  { %v1812_v49 = vmul.f32 %v2861_v35, %v3498_v2 }
 0x395   :  { %v2863_v59 = vpop.eup %2862 }
 0x396   :  { %v1811_v38 = vmul.f32 %v2863_v59, %v3501_v51 }
 0x397   :  { %v2865_v40 = vpop.eup %2864 }
 0x398   :  { %v2867_v62 = vpop.eup %2866  ;;  %2740 = vmatprep.mubr.f32.mxu0 %v1811_v38  ;;  %v1814_v24 = vmul.f32 %v2865_v40, %v3505_v57 }
 0x399   :  { %2741 = vmatmul.mubr.f32.gmra.mxu0 %v1812_v49  ;;  %v1813_v1 = vmul.f32 %v2867_v62, %v3509_v43 }
 0x39b   :  { %2743 = vmatprep.mubr.f32.mxu0 %v1813_v1 }
 0x39d   :  { %2744 = vmatmul.mubr.f32.gmra.mxu0 %v1814_v24 }
 0x44e   :  { %v2736_v17 = vpop.f32.mrf.mxu0 }
 0x44f   :  { %v1921_v4 = vadd.f32 %v2736_v17, %v3525_v39 }
 0x450   :  { %v1881_v5 = vpop.f32.mrf.mxu0 }
 0x451   :  { %v1929_v52 = vmul.f32 %v1921_v4, %v3256_v31  ;;  %v1920_v61 = vadd.f32 %v1881_v5, %v3531_v16 }
 0x452   :  { %v2739_v47 = vpop.f32.mrf.mxu0 }
 0x453   :  { %v1943_v60 = vsel %vm1119_vm10, %v1929_v52, -inf  ;;  %v1928_v12 = vmul.f32 %v1920_v61, %v3236_v18  ;;  %v1923_v20 = vadd.f32 %v2739_v47, %v3537_v54 }
 0x454   :  { %v1944_v50 = vrot.slane %v1943_v60, 4  ;;  %v1891_v8 = vpop.f32.mrf.mxu0 }
 0x455   :  { %v1936_v23 = vsel %vm1119_vm10, %v1928_v12, -inf  ;;  %v1931_v42 = vmul.f32 %v1923_v20, %v3253_v30  ;;  %v1922_v39 = vadd.f32 %v1891_v8, %v3543_v19 }
 0x456   :  { %v1945_v27 = vmax.f32 %v1943_v60, %v1944_v50  ;;  %v1937_v36 = vrot.slane %v1936_v23, 4 }
 0x457   :  { %v1957_v31 = vsel %vm1119_vm10, %v1931_v42, -inf  ;;  %v1930_v16 = vmul.f32 %v1922_v39, %v3862_v25 }
 0x458   :  { %v1946_v34 = vrot.slane %v1945_v27, 2  ;;  %v1938_v26 = vmax.f32 %v1936_v23, %v1937_v36  ;;  %v1958_v41 = vrot.slane %v1957_v31, 4 }
 0x459   :  { %v1950_v18 = vsel %vm1119_vm10, %v1930_v16, -inf  ;;  %v2742_v54 = vpop.f32.mrf.mxu0 }
 0x45a   :  { %v1947_v7 = vmax.f32 %v1945_v27, %v1946_v34  ;;  %v1939_v53 = vrot.slane %v1938_v26, 2  ;;  %v1959_v58 = vmax.f32 %v1957_v31, %v1958_v41  ;;  %v1951_v21 = vrot.slane %v1950_v18, 4 }
 0x45b   :  { %v1925_v30 = vadd.f32 %v2742_v54, %v3549_v32  ;;  %v1901_v44 = vpop.f32.mrf.mxu0 }
 0x45c   :  { %v1948_v19 = vrot.slane %v1947_v7, 1  ;;  %v1940_v55 = vmax.f32 %v1938_v26, %v1939_v53  ;;  %v1960_v35 = vrot.slane %v1959_v58, 2  ;;  %v1952_v59 = vmax.f32 %v1950_v18, %v1951_v21 }
 0x45d   :  { %v1933_v38 = vmul.f32 %v1925_v30, %v3864_v28  ;;  %v1924_v25 = vadd.f32 %v1901_v44, %v3555_v45  ;;  %v2745_v40 = vpop.f32.mrf.mxu0 }
 0x45e   :  { %v1949_v49 = vmax.f32 %v1947_v7, %v1948_v19  ;;  %v1941_v62 = vrot.slane %v1940_v55, 1  ;;  %v1961_v1 = vmax.f32 %v1959_v58, %v1960_v35  ;;  %v1953_v24 = vrot.slane %v1952_v59, 2 }
 0x45f   :  { %v1971_v17 = vsel %vm1119_vm10, %v1933_v38, -inf  ;;  %v1932_v4 = vmul.f32 %v1924_v25, %v3866_v11  ;;  %v1927_v32 = vadd.f32 %v2745_v40, %v3561_v6  ;;  %v1911_v5 = vpop.f32.mrf.mxu0 }
 0x460   :  { %v1993_v61 = vsub.f32 %v1929_v52, %v1949_v49  ;;  %v1942_v47 = vmax.f32 %v1940_v55, %v1941_v62  ;;  %v1962_v60 = vrot.slane %v1961_v1, 1  ;;  %v1954_v20 = vmax.f32 %v1952_v59, %v1953_v24 }
 0x461   :  { %v1972_v50 = vrot.slane %v1971_v17, 4  ;;  %v1964_v28 = vsel %vm1119_vm10, %v1932_v4, -inf  ;;  %v1935_v45 = vmul.f32 %v1927_v32, %v3868_v48  ;;  %v1926_v8 = vadd.f32 %v1911_v5, %v3568_v22 }
 0x462   :  { %v2002_v23 = vmul.f32 1.442695, %v1993_v61  ;;  %v1992_v39 = vsub.f32 %v1928_v12, %v1942_v47  ;;  %v1963_v27 = vmax.f32 %v1961_v1, %v1962_v60  ;;  %v1955_v36 = vrot.slane %v1954_v20, 1 }
 0x463   :  { %v1973_v31 = vmax.f32 %v1971_v17, %v1972_v50  ;;  %v1965_v11 = vrot.slane %v1964_v28, 4  ;;  %v1985_v6 = vsel %vm1119_vm10, %v1935_v45, -inf  ;;  %v1934_v52 = vmul.f32 %v1926_v8, %v3870_v46 }
 0x464   :  { %2868 = vpow2.f32 %v2002_v23  ;;  %v2000_v34 = vmul.f32 1.442695, %v1992_v39  ;;  %v1995_v26 = vsub.f32 %v1931_v42, %v1963_v27  ;;  %v1956_v41 = vmax.f32 %v1954_v20, %v1955_v36 }
 0x465   :  { %v1974_v18 = vrot.slane %v1973_v31, 2  ;;  %v1966_v54 = vmax.f32 %v1964_v28, %v1965_v11  ;;  %v1986_v7 = vrot.slane %v1985_v6, 4  ;;  %v1978_v48 = vsel %vm1119_vm10, %v1934_v52, -inf }
 0x466   :  { %2870 = vpow2.f32 %v2000_v34  ;;  %v2006_v22 = vmul.f32 1.442695, %v1995_v26  ;;  %v1994_v12 = vsub.f32 %v1930_v16, %v1956_v41  ;;  %v1979_v53 = vrot.slane %v1978_v48, 4 }
 0x467   :  { %v1975_v58 = vmax.f32 %v1973_v31, %v1974_v18  ;;  %v1967_v21 = vrot.slane %v1966_v54, 2  ;;  %v1987_v30 = vmax.f32 %v1985_v6, %v1986_v7 }
 0x468   :  { %2872 = vpow2.f32 %v2006_v22  ;;  %v2004_v44 = vmul.f32 1.442695, %v1994_v12  ;;  %v1980_v19 = vmax.f32 %v1978_v48, %v1979_v53 }
 0x469   :  { %v1976_v46 = vrot.slane %v1975_v58, 1  ;;  %v1968_v55 = vmax.f32 %v1966_v54, %v1967_v21  ;;  %v1988_v35 = vrot.slane %v1987_v30, 2 }
 0x46a   :  { %2874 = vpow2.f32 %v2004_v44  ;;  %v1981_v42 = vrot.slane %v1980_v19, 2 }
 0x46b   :  { %v1977_v59 = vmax.f32 %v1975_v58, %v1976_v46  ;;  %v1969_v25 = vrot.slane %v1968_v55, 1  ;;  %v1989_v40 = vmax.f32 %v1987_v30, %v1988_v35 }
 0x46c   :  { %v1982_v49 = vmax.f32 %v1980_v19, %v1981_v42 }
 0x46d   :  { %v1997_v62 = vsub.f32 %v1933_v38, %v1977_v59  ;;  %v1970_v1 = vmax.f32 %v1968_v55, %v1969_v25  ;;  %v1990_v24 = vrot.slane %v1989_v40, 1 }
 0x46e   :  { %v1983_v16 = vrot.slane %v1982_v49, 1 }
 0x46f   :  { %v2010_v17 = vmul.f32 1.442695, %v1997_v62  ;;  %v1996_v32 = vsub.f32 %v1932_v4, %v1970_v1  ;;  %v1991_v5 = vmax.f32 %v1989_v40, %v1990_v24 }
 0x470   :  { %v1984_v61 = vmax.f32 %v1982_v49, %v1983_v16 }
 0x471   :  { %v3706_v47 = vpop.eup %2868  ;;  %2876 = vpow2.f32 %v2010_v17  ;;  %v2008_v60 = vmul.f32 1.442695, %v1996_v32  ;;  %v1999_v20 = vsub.f32 %v1935_v45, %v1991_v5 }
 0x472   :  { %v2023_v50 = vsel %vm1119_vm10, %v3706_v47, 0.0  ;;  %v1998_v28 = vsub.f32 %v1934_v52, %v1984_v61 }
 0x473   :  { %v3710_v8 = vpop.eup %2870  ;;  %v2024_v23 = vrot.slane %v2023_v50, 4  ;;  %2878 = vpow2.f32 %v2008_v60  ;;  %v2014_v38 = vmul.f32 1.442695, %v1999_v20 }
 0x474   :  { %v2016_v39 = vsel %vm1119_vm10, %v3710_v8, 0.0  ;;  %v2012_v4 = vmul.f32 1.442695, %v1998_v28 }
 0x475   :  { %v3714_v27 = vpop.eup %2872  ;;  %v2025_v36 = vadd.f32 %v2024_v23, %v2023_v50  ;;  %v2017_v31 = vrot.slane %v2016_v39, 4  ;;  %2880 = vpow2.f32 %v2014_v38 }
 0x476   :  { %v2037_v45 = vsel %vm1119_vm10, %v3714_v27, 0.0  ;;  %2882 = vpow2.f32 %v2012_v4 }
 0x477   :  { %v3718_v11 = vpop.eup %2874  ;;  %v2026_v6 = vrot.slane %v2025_v36, 2  ;;  %v2018_v52 = vadd.f32 %v2017_v31, %v2016_v39  ;;  %v2038_v34 = vrot.slane %v2037_v45, 4 }
 0x478   :  { %v2030_v26 = vsel %vm1119_vm10, %v3718_v11, 0.0 }
 0x479   :  { %v2027_v41 = vadd.f32 %v2026_v6, %v2025_v36  ;;  %v2019_v18 = vrot.slane %v2018_v52, 2  ;;  %v2039_v54 = vadd.f32 %v2038_v34, %v2037_v45  ;;  %v2031_v7 = vrot.slane %v2030_v26, 4 }
 0x47b   :  { %v2028_v48 = vrot.slane %v2027_v41, 1  ;;  %v2020_v22 = vadd.f32 %v2019_v18, %v2018_v52  ;;  %v2040_v12 = vrot.slane %v2039_v54, 2  ;;  %v2032_v53 = vadd.f32 %v2031_v7, %v2030_v26 }
 0x47d   :  { %v2029_v58 = vadd.f32 %v2028_v48, %v2027_v41  ;;  %v2021_v21 = vrot.slane %v2020_v22, 1  ;;  %v2041_v30 = vadd.f32 %v2040_v12, %v2039_v54  ;;  %v2033_v44 = vrot.slane %v2032_v53, 2 }
 0x47e   :  { %v3722_v19 = vpop.eup %2876 }
 0x47f   :  { %2884 = vrcp.f32 %v2029_v58  ;;  %v2042_v46 = vrot.slane %v2041_v30, 1  ;;  %v2034_v55 = vadd.f32 %v2033_v44, %v2032_v53  ;;  %v2051_v35 = vsel %vm1119_vm10, %v3722_v19, 0.0 }
 0x480   :  { %v2879_v42 = vpop.eup %2878  ;;  %v2052_v59 = vrot.slane %v2051_v35, 4  ;;  %v2022_v25 = vadd.f32 %v2021_v21, %v2020_v22 }
 0x481   :  { %v2035_v40 = vrot.slane %v2034_v55, 1  ;;  %v2044_v49 = vsel %vm1119_vm10, %v2879_v42, 0.0  ;;  %v2043_v62 = vadd.f32 %v2042_v46, %v2041_v30 }
 0x482   :  { %v2881_v1 = vpop.eup %2880  ;;  %v2053_v24 = vadd.f32 %v2052_v59, %v2051_v35  ;;  %v2045_v16 = vrot.slane %v2044_v49, 4  ;;  %2886 = vrcp.f32 %v2022_v25 }
 0x483   :  { %v2883_v17 = vpop.eup %2882  ;;  %v2065_v32 = vsel %vm1119_vm10, %v2881_v1, 0.0  ;;  %v2036_v5 = vadd.f32 %v2035_v40, %v2034_v55  ;;  %2888 = vrcp.f32 %v2043_v62 }
 0x484   :  { %v2054_v61 = vrot.slane %v2053_v24, 2  ;;  %v2046_v60 = vadd.f32 %v2045_v16, %v2044_v49  ;;  %v2066_v20 = vrot.slane %v2065_v32, 4  ;;  %v2058_v50 = vsel %vm1119_vm10, %v2883_v17, 0.0 }
 0x485   :  { %v2059_v28 = vrot.slane %v2058_v50, 4  ;;  %2890 = vrcp.f32 %v2036_v5 }
 0x486   :  { %v2055_v23 = vadd.f32 %v2054_v61, %v2053_v24  ;;  %v2047_v38 = vrot.slane %v2046_v60, 2  ;;  %v2067_v39 = vadd.f32 %v2066_v20, %v2065_v32 }
 0x487   :  { %v2060_v4 = vadd.f32 %v2059_v28, %v2058_v50 }
 0x488   :  { %v2056_v36 = vrot.slane %v2055_v23, 1  ;;  %v2048_v31 = vadd.f32 %v2047_v38, %v2046_v60  ;;  %v2068_v45 = vrot.slane %v2067_v39, 2 }
 0x489   :  { %v2061_v6 = vrot.slane %v2060_v4, 2 }
 0x48a   :  { %v2049_v52 = vrot.slane %v2048_v31, 1  ;;  %v2069_v34 = vadd.f32 %v2068_v45, %v2067_v39  ;;  %v2057_v26 = vadd.f32 %v2056_v36, %v2055_v23 }
 0x48b   :  { %v2062_v41 = vadd.f32 %v2061_v6, %v2060_v4 }
 0x48c   :  { %v2885_v18 = vpop.eup %2884  ;;  %v2070_v54 = vrot.slane %v2069_v34, 1  ;;  %v2050_v7 = vadd.f32 %v2049_v52, %v2048_v31  ;;  %2892 = vrcp.f32 %v2057_v26 }
 0x48d   :  { %v2063_v48 = vrot.slane %v2062_v41, 1  ;;  %v2089_v53 = vmul.f32 %v2885_v18, %v3706_v47 }
 0x48e   :  { %2894 = vrcp.f32 %v2050_v7  ;;  %v2071_v22 = vadd.f32 %v2070_v54, %v2069_v34 }
 0x48f   :  { %v2887_v12 = vpop.eup %2886  ;;  %v2064_v58 = vadd.f32 %v2063_v48, %v2062_v41  ;;  %v2097_v55 = vmul.f32 %v2089_v53, %v3872_v9 }
 0x490   :  { %v2889_v21 = vpop.eup %2888  ;;  %v2088_v30 = vmul.f32 %v2887_v12, %v3710_v8  ;;  %2896 = vrcp.f32 %v2071_v22 }
 0x491   :  { %2898 = vrcp.f32 %v2064_v58  ;;  %v2091_v59 = vmul.f32 %v2889_v21, %v3714_v27 }
 0x492   :  { %v2891_v44 = vpop.eup %2890  ;;  %v2096_v46 = vmul.f32 %v2088_v30, %v3871_v33 }
 0x493   :  { %v2090_v35 = vmul.f32 %v2891_v44, %v3718_v11  ;;  %v2099_v8 = vmul.f32 %v2091_v59, %v3875_v14 }
 0x494   :  { %2748 = vmatprep.mubr.msk.f32.mxu1 %vm1119_vm10, %v2096_v46 }
 0x495   :  { %2749 = vmatmul.mubr.msk.f32.vlgmr.msra.gmra.mxu1 %vm1119_vm10, %v2097_v55  ;;  %v2098_v47 = vmul.f32 %v2090_v35, %v3873_v0 }
 0x497   :  { %2751 = vmatprep.mubr.msk.f32.mxu1 %vm1119_vm10, %v2098_v47 }
 0x499   :  { %v2893_v25 = vpop.eup %2892  ;;  %2752 = vmatmul.mubr.msk.f32.gmra.mxu1 %vm1119_vm10, %v2099_v8 }
 0x49a   :  { %v2093_v9 = vmul.f32 %v2893_v25, %v3722_v19 }
 0x49b   :  { %v2895_v33 = vpop.eup %2894 }
 0x49c   :  { %v2092_v40 = vmul.f32 %v2895_v33, %v2879_v42  ;;  %v2101_v62 = vmul.f32 %v2093_v9, %v3880_v10 }
 0x49d   :  { %v2897_v11 = vpop.eup %2896 }
 0x49e   :  { %v2899_v49 = vpop.eup %2898  ;;  %v2100_v27 = vmul.f32 %v2092_v40, %v3879_v63  ;;  %v2095_v16 = vmul.f32 %v2897_v11, %v2881_v1 }
 0x49f   :  { %v2094_v24 = vmul.f32 %v2899_v49, %v2883_v17 }
 0x4a0   :  { %2754 = vmatprep.mubr.msk.f32.mxu1 %vm1119_vm10, %v2100_v27  ;;  %v2103_v14 = vmul.f32 %v2095_v16, %v3884_v56 }
 0x4a1   :  { %2755 = vmatmul.mubr.msk.f32.gmra.mxu1 %vm1119_vm10, %v2101_v62  ;;  %v2102_v0 = vmul.f32 %v2094_v24, %v3883_v13 }
 0x4a3   :  { %2757 = vmatprep.mubr.msk.f32.mxu1 %vm1119_vm10, %v2102_v0 }
 0x4a5   :  { %2758 = vmatmul.mubr.msk.f32.gmra.mxu1 %vm1119_vm10, %v2103_v14 }
 0x555   :  { %v2750_v19 = vpop.f32.mrf.mxu1 }
 0x556   :  { %v2234_v42 = vmul.f32 %v2750_v19, %v3486_v37 }
 0x557   :  { %v2194_v63 = vpop.f32.mrf.mxu1 }
 0x558   :  { %v2247_v32 = vrot.slane %v2234_v42, 4  ;;  %v2233_v10 = vmul.f32 %v2194_v63, %v3489_v29 }
 0x559   :  { %v2753_v1 = vpop.f32.mrf.mxu1 }
 0x55a   :  { %v2248_v17 = vadd.f32 %v2247_v32, %v2234_v42  ;;  %v2241_v5 = vrot.slane %v2233_v10, 4  ;;  %v2236_v61 = vmul.f32 %v2753_v1, %v3492_v15 }
 0x55b   :  { %v2204_v60 = vpop.f32.mrf.mxu1 }
 0x55c   :  { %v2242_v13 = vadd.f32 %v2241_v5, %v2233_v10  ;;  %v2259_v20 = vrot.slane %v2236_v61, 4  ;;  %v2235_v50 = vmul.f32 %v2204_v60, %v3495_v3  ;;  %v2249_v56 = vrot.slane %v2248_v17, 2 }
 0x55e   :  { %v2243_v28 = vrot.slane %v2242_v13, 2  ;;  %v2260_v23 = vadd.f32 %v2259_v20, %v2236_v61  ;;  %v2253_v38 = vrot.slane %v2235_v50, 4  ;;  %v2250_v36 = vadd.f32 %v2249_v56, %v2248_v17 }
 0x560   :  { %v2244_v39 = vadd.f32 %v2243_v28, %v2242_v13  ;;  %v2254_v37 = vadd.f32 %v2253_v38, %v2235_v50  ;;  %v2261_v31 = vrot.slane %v2260_v23, 2  ;;  %v2251_v3 = vrot.slane %v2250_v36, 1 }
 0x561   :  { %v2756_v4 = vpop.f32.mrf.mxu1 }
 0x562   :  { %v2255_v29 = vrot.slane %v2254_v37, 2  ;;  %v2238_v45 = vmul.f32 %v2756_v4, %v3498_v2  ;;  %v2245_v52 = vrot.slane %v2244_v39, 1  ;;  %v2262_v18 = vadd.f32 %v2261_v31, %v2260_v23 }
 0x563   :  { %v2214_v6 = vpop.f32.mrf.mxu1  ;;  %v2252_v46 = vadd.f32 %v2251_v3, %v2250_v36 }
 0x564   :  { %v2256_v15 = vadd.f32 %v2255_v29, %v2254_v37  ;;  %v2271_v34 = vrot.slane %v2238_v45, 4  ;;  %v2237_v26 = vmul.f32 %v2214_v6, %v3501_v51  ;;  %v2246_v53 = vadd.f32 %v2245_v52, %v2244_v39 }
 0x565   :  { %v2759_v41 = vpop.f32.mrf.mxu1  ;;  %v2263_v55 = vrot.slane %v2262_v18, 1 }
 0x566   :  { %v2257_v54 = vrot.slane %v2256_v15, 1  ;;  %v2240_v7 = vmul.f32 %v2759_v41, %v3505_v57  ;;  %v2272_v48 = vadd.f32 %v2271_v34, %v2238_v45  ;;  %v2265_v22 = vrot.slane %v2237_v26, 4 }
 0x567   :  { %v2224_v12 = vpop.f32.mrf.mxu1  ;;  %2900 = vtanh.f32 %v2246_v53  ;;  %v2264_v9 = vadd.f32 %v2263_v55, %v2262_v18 }
 0x568   :  { %v2283_v58 = vrot.slane %v2240_v7, 4  ;;  %v2239_v21 = vmul.f32 %v2224_v12, %v3509_v43  ;;  %v2258_v2 = vadd.f32 %v2257_v54, %v2256_v15  ;;  %v2273_v30 = vrot.slane %v2272_v48, 2 }
 0x569   :  { %v2266_v44 = vadd.f32 %v2265_v22, %v2237_v26 }
 0x56a   :  { %v2284_v35 = vadd.f32 %v2283_v58, %v2240_v7  ;;  %v2277_v51 = vrot.slane %v2239_v21, 4  ;;  %v2274_v59 = vadd.f32 %v2273_v30, %v2272_v48  ;;  %2902 = vtanh.f32 %v2258_v2 }
 0x56b   :  { %v2267_v47 = vrot.slane %v2266_v44, 2  ;;  %2904 = vtanh.f32 %v2252_v46 }
 0x56c   :  { %v2285_v8 = vrot.slane %v2284_v35, 2  ;;  %v2278_v25 = vadd.f32 %v2277_v51, %v2239_v21  ;;  %v2275_v57 = vrot.slane %v2274_v59, 1  ;;  %2906 = vtanh.f32 %v2264_v9 }
 0x56d   :  { %v2268_v33 = vadd.f32 %v2267_v47, %v2266_v44 }
 0x56e   :  { %v2286_v40 = vadd.f32 %v2285_v8, %v2284_v35  ;;  %v2279_v11 = vrot.slane %v2278_v25, 2  ;;  %v2276_v62 = vadd.f32 %v2275_v57, %v2274_v59 }
 0x56f   :  { %v2269_v43 = vrot.slane %v2268_v33, 1 }
 0x570   :  { %v2287_v49 = vrot.slane %v2286_v40, 1  ;;  %v2280_v27 = vadd.f32 %v2279_v11, %v2278_v25 }
 0x571   :  { %v2270_v24 = vadd.f32 %v2269_v43, %v2268_v33 }
 0x572   :  { %v2281_v16 = vrot.slane %v2280_v27, 1  ;;  %v2288_v0 = vadd.f32 %v2287_v49, %v2286_v40 }
 0x573   :  { %2908 = vtanh.f32 %v2270_v24 }
 0x574   :  { %v2282_v14 = vadd.f32 %v2281_v16, %v2280_v27  ;;  %2910 = vtanh.f32 %v2276_v62  ;;  %v2901_v19 = vpop.eup %2900 }
 0x576   :  { %2912 = vtanh.f32 %v2282_v14 }
 0x577   :  { %2914 = vtanh.f32 %v2288_v0  ;;  %v2903_v42 = vpop.eup %2902 }
 0x578   :  { %v2905_v63 = vpop.eup %2904 }
 0x579   :  { %v2306_v32 = vsel %vm2305_vm1, %v2905_v63, %v2901_v19  ;;  %v2907_v1 = vpop.eup %2906 }
 0x57a   :  { %v2308_v10 = vsel %vm2307_vm4, %v2903_v42, %v2306_v32 }
 0x57b   :  { %v2310_v5 = vsel %vm2309_vm5, %v2907_v1, %v2308_v10 }
 0x580   :  { %v2909_v17 = vpop.eup %2908 }
 0x581   :  { %v2312_v61 = vsel %vm2311_vm6, %v2909_v17, %v2310_v5  ;;  %v2911_v60 = vpop.eup %2910 }
 0x582   :  { %v2314_v20 = vsel %vm2313_vm7, %v2911_v60, %v2312_v61 }
 0x583   :  { %v2913_v13 = vpop.eup %2912 }
 0x584   :  { %v2915_v50 = vpop.eup %2914  ;;  %v2316_v56 = vsel %vm2315_vm8, %v2913_v13, %v2314_v20 }
 0x585   :  { %v2318_v28 = vsel %vm2317_vm9, %v2915_v50, %v2316_v56 }
 0x586   :  { %2320 = vst [vmem:[#allocation2] sm:$0xff] %v2318_v28 }
 0x587   :  { %2927 = shalt.err (!%p2924_p4)
}
 0x588   :  { %2330 = dma.vmem_to_hbm [thread:$0]  %s2328_s16, 128, %s3767_s6, [#allocation3]  }
 0x589   :  { %2936 = dma.done.wait [#allocation3], 128  }
 0x58a   :  { %2937 = vsyncadd [#allocation3], 4294967168 }
 0x58b   :  { %2334 = vsyncpa [#allocation3], 1 }

</bundles_post_ra>
